<compile_context>
chip_gen: v6e
topology: v6e:2x2x1
jax: 0.10.0
libtpu: 0.0.40
codegen_flags: <defaults>
</compile_context>

<pallas_src>
import functools

import numpy as np

import jax
import jax.numpy as jnp
from jax.experimental import pallas as pl
from jax.experimental.pallas import tpu as pltpu


C1, C2 = 8, 16        # conv channels of the scaled-down Cnn14-like base
CMAX = max(C1, C2)
OUT_EMB = 32          # pengi_args.out_emb
D_PROJ = 32           # pengi_args.d_proj
BN_EPS = 1e-5
LN_EPS = 1e-5


def _gelu_tanh(x):
    c = 0.7978845608028654  # sqrt(2/pi)
    return 0.5 * x * (1.0 + jnp.tanh(c * (x + 0.044715 * x * x * x)))


# -----------------------------------------------------------------------------
# Packed-constant slab layout (static; shared by wrapper and kernel)
# -----------------------------------------------------------------------------
def _const_layout(H, W):
    h2, w2 = H // 2, W // 2
    sp1 = (H + 2) * (W + 2)
    sp2 = (h2 + 2) * (w2 + 2)
    entries = [
        ("w11", C1, 9),           ("b11", C1, 1),
        ("w12", C1, 9 * C1),      ("b12", C1, 1),
        ("w21", C2, 9 * C1),      ("b21", C2, 1),
        ("w22", C2, 9 * C2),      ("b22", C2, 1),
        ("fc1_w", OUT_EMB, C2),   ("fc1_b", OUT_EMB, 1),
        ("pw1", D_PROJ, OUT_EMB), ("pw2", D_PROJ, D_PROJ),
        ("ln_g", D_PROJ, 1),      ("ln_b", D_PROJ, 1),
        ("poolw", W, w2),
        ("mask1", 1, sp1),        ("mask2", 1, sp2),
    ]
    nrows = max(r for _, r, _ in entries)
    nrows = (nrows + 7) // 8 * 8
    offs, col = {}, 0
    for name, r, c in entries:
        offs[name] = (col, r, c)
        col += c
    return offs, nrows, col


# -----------------------------------------------------------------------------
# Fused kernel: conv block 1 -> pool -> conv block 2 -> pool + global pooling
#               -> fc1 + ReLU -> projection head (GELU, residual, LayerNorm)
# One grid step processes one batch element end-to-end, fully lane-dense.
# -----------------------------------------------------------------------------
def _pengi_fused_kernel(x_ref, c_ref, o_ref, act_a, act_b, x9,
                        *, offs, H, W, margin):
    wp1, sp1 = W + 2, (H + 2) * (W + 2)
    h2, w2 = H // 2, W // 2
    wp2, sp2 = w2 + 2, (h2 + 2) * (w2 + 2)
    n_t = h2 // 2

    def cs(name):
        col, r, c = offs[name]
        return c_ref[0:r, col:col + c]

    # Fresh zero margins each grid step: no read below sees uninitialised VMEM.
    act_a[...] = jnp.zeros_like(act_a)
    act_b[...] = jnp.zeros_like(act_b)

    def conv3x3(read_rows, wname, bname, mname, cin, sp, wp):
        """3x3 'same' conv + folded-BN bias + ReLU on a padded flat map.

        read_rows(lo, hi) -> (cin, hi-lo) lane slice of the padded-flat input
        (including zero margins).  Output padding positions are forced to 0 so
        the result is directly consumable as the next layer's zero padding.
        """
        w = cs(wname)                                   # (cout, 9*cin)
        b = cs(bname)                                   # (cout, 1)
        mask = cs(mname)                                # (1, sp)
        if cin == 1:
            # K=9 gains nothing on the MXU; 9 broadcast FMAs on the VPU.
            acc = jnp.zeros((w.shape[0], sp), jnp.float32)
            for k in range(9):
                dh, dw = divmod(k, 3)
                off = (dh - 1) * wp + (dw - 1)
                acc = acc + w[:, k:k + 1] * read_rows(margin + off,
                                                      margin + off + sp)
        else:
            # Stack the 9 shifted slices -> ONE MXU matmul with K = 9*cin.
            for k in range(9):
                dh, dw = divmod(k, 3)
                off = (dh - 1) * wp + (dw - 1)
                x9[k * cin:(k + 1) * cin, 0:sp] = read_rows(margin + off,
                                                            margin + off + sp)
            acc = jnp.dot(w, x9[0:9 * cin, 0:sp],
                          preferred_element_type=jnp.float32)
        y = jnp.maximum(acc + b, 0.0)
        return jnp.where(mask > 0.5, y, 0.0)

    # ---- conv block 1 (on the (H+2)x(W+2) padded flat map) -------------------
    y = conv3x3(lambda lo, hi: x_ref[0, :, lo:hi], "w11", "b11", "mask1",
                1, sp1, wp1)
    act_a[0:C1, margin:margin + sp1] = y
    y = conv3x3(lambda lo, hi: act_a[0:C1, lo:hi], "w12", "b12", "mask1",
                C1, sp1, wp1)
    act_b[0:C1, margin:margin + sp1] = y

    # ---- 2x2 average pool: map1 -> map2 (map2 padding written as exact 0) ----
    poolw = cs("poolw")                                 # (W, w2), 0.25 entries
    act_a[:, margin:margin + sp2] = jnp.zeros((CMAX, sp2), jnp.float32)
    for i in range(h2):
        r1 = margin + (2 * i + 1) * wp1 + 1
        r2 = margin + (2 * i + 2) * wp1 + 1
        rows = act_b[0:C1, r1:r1 + W] + act_b[0:C1, r2:r2 + W]   # (C1, W)
        q = margin + (i + 1) * wp2 + 1
        act_a[0:C1, q:q + w2] = jnp.dot(rows, poolw,
                                        preferred_element_type=jnp.float32)

    # ---- conv block 2 ---------------------------------------------------------
    y = conv3x3(lambda lo, hi: act_a[0:C1, lo:hi], "w21", "b21", "mask2",
                C1, sp2, wp2)
    act_b[0:C2, margin:margin + sp2] = y
    y = conv3x3(lambda lo, hi: act_b[0:C2, lo:hi], "w22", "b22", "mask2",
                C2, sp2, wp2)
    act_a[0:C2, margin:margin + sp2] = y

    # ---- second 2x2 avg-pool fused with freq-mean and time-(max + mean) ------
    # freq-mean(avg_pool2x2(x))[t] == mean over the 2 x w2 slab of rows 2t,2t+1
    inv = 1.0 / (2.0 * w2)
    t_sum = jnp.zeros((C2, 1), jnp.float32)
    t_max = jnp.full((C2, 1), -jnp.inf, jnp.float32)
    for t in range(n_t):            # n_t tiny here; time-tile at real sizes
        r1 = margin + (2 * t + 1) * wp2 + 1
        r2 = margin + (2 * t + 2) * wp2 + 1
        slab = act_a[0:C2, r1:r1 + w2] + act_a[0:C2, r2:r2 + w2]
        sm = jnp.sum(slab, axis=1, keepdims=True) * inv          # (C2, 1)
        t_sum = t_sum + sm
        t_max = jnp.maximum(t_max, sm)
    feat = t_max + t_sum * (1.0 / n_t)                           # (C2, 1)

    # ---- fc1 + ReLU -----------------------------------------------------------
    emb = jnp.dot(cs("fc1_w"), feat, preferred_element_type=jnp.float32)
    emb = jnp.maximum(emb + cs("fc1_b"), 0.0)                    # (OUT_EMB, 1)

    # ---- projection head: linear1 -> GELU -> linear2 -> +res -> LayerNorm ----
    # (dropout p=0.5 is identity in eval mode)
    e1 = jnp.dot(cs("pw1"), emb, preferred_element_type=jnp.float32)
    e2 = jnp.dot(cs("pw2"), _gelu_tanh(e1), preferred_element_type=jnp.float32)
    z = e1 + e2
    mu = jnp.mean(z, axis=0, keepdims=True)
    var = jnp.mean((z - mu) ** 2, axis=0, keepdims=True)
    zn = (z - mu) * jax.lax.rsqrt(var + LN_EPS)
    o_ref[0] = zn * cs("ln_g") + cs("ln_b")                      # (D_PROJ, 1)


# -----------------------------------------------------------------------------
# Trace-time constants (padding masks, width-pooling matrix) + BN folding
# -----------------------------------------------------------------------------
def _valid_mask(h, w):
    m = np.zeros((h + 2, w + 2), np.float32)
    m[1:h + 1, 1:w + 1] = 1.0
    return m.reshape(1, (h + 2) * (w + 2))


def _pool_cols_matrix(w):
    w2 = w // 2
    P = np.zeros((w, w2), np.float32)
    for j in range(w2):
        P[2 * j, j] = 0.25
        P[2 * j + 1, j] = 0.25
    return P


def _fold_bn(w, bn):
    # eval-mode BN folded into the conv weight/bias (Cnn14 convs have no bias)
    scale = bn["gamma"] * jax.lax.rsqrt(bn["var"] + BN_EPS)
    return w * scale[None, :], (bn["beta"] - scale * bn["mean"])[None, :]


# -----------------------------------------------------------------------------
# Wrapper
# -----------------------------------------------------------------------------
@jax.jit
def custom_pengi_forward(x_nchw, p):
    """CustomPENGI.forward(audio) -> audio_features (= audio_encoder(audio)[0])."""
    B, cin, H, W = x_nchw.shape
    assert cin == 1 and H % 4 == 0 and W % 4 == 0

    wp1, sp1 = W + 2, (H + 2) * (W + 2)
    h2, w2 = H // 2, W // 2
    sp2 = (h2 + 2) * (w2 + 2)
    margin = ((wp1 + 1) + 7) // 8 * 8          # covers the max conv tap shift
    rows1 = margin + sp1 + margin

    # Lane-dense input: padded row-major-flat spatial map on the lane axis.
    # C == 1 so the NCHW -> flat move is a reshape (no transpose).
    x = x_nchw.reshape(B, H, W).astype(jnp.float32)
    x = jnp.pad(x, ((0, 0), (1, 1), (1, 1))).reshape(B, sp1)
    x = jnp.pad(x, ((0, 0), (margin, margin)))[:, None, :]      # (B, 1, rows1)

    # Fold BN and pack every small constant into one lane-dense f32 slab.
    offs, nrows, ncols = _const_layout(H, W)
    w11, b11 = _fold_bn(p["w11"], p["bn11"])
    w12, b12 = _fold_bn(p["w12"], p["bn12"])
    w21, b21 = _fold_bn(p["w21"], p["bn21"])
    w22, b22 = _fold_bn(p["w22"], p["bn22"])
    blocks = {
        "w11": w11.T, "b11": b11.T, "w12": w12.T, "b12": b12.T,
        "w21": w21.T, "b21": b21.T, "w22": w22.T, "b22": b22.T,
        "fc1_w": p["fc1_w"].T, "fc1_b": p["fc1_b"].T,
        "pw1": p["pw1"].T, "pw2": p["pw2"].T,
        "ln_g": p["ln_g"].T, "ln_b": p["ln_b"].T,
        "poolw": jnp.asarray(_pool_cols_matrix(W)),
        "mask1": jnp.asarray(_valid_mask(H, W)),
        "mask2": jnp.asarray(_valid_mask(h2, w2)),
    }
    slab = jnp.zeros((nrows, ncols), jnp.float32)
    for name, arr in blocks.items():
        col, r, c = offs[name]
        slab = slab.at[0:r, col:col + c].set(arr.astype(jnp.float32))

    kernel = functools.partial(_pengi_fused_kernel, offs=offs, H=H, W=W,
                               margin=margin)

    flops = 2 * B * (9 * 1 * C1 * sp1 + 9 * C1 * C1 * sp1
                     + 9 * C1 * C2 * sp2 + 9 * C2 * C2 * sp2
                     + C1 * W * w2 * h2
                     + OUT_EMB * C2 + D_PROJ * OUT_EMB + D_PROJ * D_PROJ)
    cost = pl.CostEstimate(
        flops=int(flops),
        transcendentals=int(B * D_PROJ),
        bytes_accessed=int(4 * (x.size + slab.size + B * D_PROJ)))

    out = pl.pallas_call(
        kernel,
        out_shape=jax.ShapeDtypeStruct((B, D_PROJ, 1), jnp.float32),
        grid=(B,),
        in_specs=[
            pl.BlockSpec((1, 1, rows1), lambda b: (b, 0, 0)),    # spectrogram
            pl.BlockSpec((nrows, ncols), lambda b: (0, 0)),      # const slab
        ],
        out_specs=pl.BlockSpec((1, D_PROJ, 1), lambda b: (b, 0, 0)),
        scratch_shapes=[
            pltpu.VMEM((CMAX, rows1), jnp.float32),      # activation ping
            pltpu.VMEM((CMAX, rows1), jnp.float32),      # activation pong
            pltpu.VMEM((9 * CMAX, sp1), jnp.float32),    # stacked conv taps
        ],
        compiler_params=pltpu.CompilerParams(
            dimension_semantics=("parallel",)),          # v7x: one batch / core
        cost_estimate=cost,
    )(x, slab)
    return out[:, :, 0]                                   # (B, D_PROJ)


# -----------------------------------------------------------------------------
# Pure-JAX reference (independent formulation) for a correctness check
# -----------------------------------------------------------------------------
def _reference_forward(x_nchw, p):
    with jax.default_matmul_precision("highest"):
        x = jnp.transpose(x_nchw, (0, 2, 3, 1)).astype(jnp.float32)   # NHWC

        def conv_bn_relu(x, w, bn):
            ci, co = x.shape[-1], w.shape[-1]
            wf, bf = _fold_bn(w, bn)
            y = jax.lax.conv_general_dilated(
                x, wf.reshape(3, 3, ci, co), window_strides=(1, 1),
                padding="SAME", dimension_numbers=("NHWC", "HWIO", "NHWC"))
            return jnp.maximum(y + bf, 0.0)

        def pool(x):
            B, H, W, C = x.shape
            return x.reshape(B, H // 2, 2, W // 2, 2, C).mean(axis=(2, 4))

        x = pool(conv_bn_relu(conv_bn_relu(x, p["w11"], p["bn11"]),
                              p["w12"], p["bn12"]))
        x = pool(conv_bn_relu(conv_bn_relu(x, p["w21"], p["bn21"]),
                              p["w22"], p["bn22"]))

        x = jnp.mean(x, axis=2)                            # mean over mel
        feat = jnp.max(x, axis=1) + jnp.mean(x, axis=1)    # Cnn14 temporal pool
        emb = jnp.maximum(feat @ p["fc1_w"] + p["fc1_b"], 0.0)
        e1 = emb @ p["pw1"]
        e2 = _gelu_tanh(e1) @ p["pw2"]
        z = e1 + e2
        mu = jnp.mean(z, axis=-1, keepdims=True)
        var = jnp.mean((z - mu) ** 2, axis=-1, keepdims=True)
        return (z - mu) * jax.lax.rsqrt(var + LN_EPS) * p["ln_g"] + p["ln_b"]


# -----------------------------------------------------------------------------
# Deterministic synthetic parameters
# -----------------------------------------------------------------------------
def init_params(key):
    ks = jax.random.split(key, 12)

    def nrm(k, shape, s=0.05):
        return s * jax.random.normal(k, shape, dtype=jnp.float32)

    def bn(k, c):
        g, b, m, v = jax.random.split(k, 4)
        return dict(gamma=1.0 + nrm(g, (c,)), beta=nrm(b, (c,)),
                    mean=nrm(m, (c,)), var=1.0 + jnp.abs(nrm(v, (c,))))

    return dict(
        w11=nrm(ks[0], (9 * 1, C1)),  bn11=bn(ks[1], C1),
        w12=nrm(ks[2], (9 * C1, C1)), bn12=bn(ks[3], C1),
        w21=nrm(ks[4], (9 * C1, C2)), bn21=bn(ks[5], C2),
        w22=nrm(ks[6], (9 * C2, C2)), bn22=bn(ks[7], C2),
        fc1_w=nrm(ks[8], (C2, OUT_EMB)),
        fc1_b=nrm(ks[9], (1, OUT_EMB)),
        pw1=nrm(ks[10], (OUT_EMB, D_PROJ)),
        pw2=nrm(ks[11], (D_PROJ, D_PROJ)),
        ln_g=jnp.ones((1, D_PROJ), jnp.float32),
        ln_b=jnp.zeros((1, D_PROJ), jnp.float32),
    )


if __name__ == "__main__":
    key = jax.random.PRNGKey(0)
    k_in, k_par = jax.random.split(key)

    # "audio" input, precomputed log-mel spectrogram path: (B, 1, T, mel) NCHW
    audio = jax.random.normal(k_in, (2, 1, 16, 16), dtype=jnp.float32)
    params = init_params(k_par)

    out = custom_pengi_forward(audio, params)
    out = jax.block_until_ready(out)

    assert out.shape == (2, D_PROJ), out.shape
    assert bool(jnp.all(jnp.isfinite(out)))

    ref = _reference_forward(audio, params)
    max_err = float(jnp.max(jnp.abs(out - ref)))
    assert max_err < 1e-3, f"mismatch vs reference: {max_err}"

    print("KERNEL_OK")
</pallas_src>

<mosaic_0001>
module attributes {stable_mosaic.version = 11 : i64} {
  func.func @_pengi_fused_kernel(%arg0: i32, %arg1: memref<1x1x372xf32, #tpu.memory_space<vmem>>, %arg2: memref<32x816xf32, #tpu.memory_space<vmem>>, %arg3: memref<1x32x1xf32, #tpu.memory_space<vmem>>, %arg4: memref<16x372xf32, #tpu.memory_space<vmem>>, %arg5: memref<16x372xf32, #tpu.memory_space<vmem>>, %arg6: memref<144x324xf32, #tpu.memory_space<vmem>>) attributes {dimension_semantics = [#tpu.dimension_semantics<parallel>], iteration_bounds = array<i64: 2>, scalar_prefetch = 0 : i64, scratch_operands = 3 : i64, tpu.core_type = #tpu.core_type<tc>, window_params = [{transform_indices = @transform_0, window_bounds = array<i64: 1, 1, 372>}, {pipeline_mode = #tpu.pipeline_mode<synchronous>, transform_indices = @transform_1, window_bounds = array<i64: 32, 816>}, {transform_indices = @transform_2, window_bounds = array<i64: 1, 32, 1>}]} {
    %cst = arith.constant 0.000000e+00 : f32
    %0 = vector.broadcast %cst : f32 to vector<16x372xf32>
    %c0 = arith.constant 0 : index
    %c0_0 = arith.constant 0 : index
    %1 = vector.load %arg4[%c0, %c0_0] : memref<16x372xf32, #tpu.memory_space<vmem>>, vector<16x372xf32>
    tpu.vector_store %arg4[%c0, %c0_0], %0 {strides = array<i32>} : memref<16x372xf32, #tpu.memory_space<vmem>>, vector<16x372xf32>,
    %cst_1 = arith.constant 0.000000e+00 : f32
    %2 = vector.broadcast %cst_1 : f32 to vector<16x372xf32>
    %c0_2 = arith.constant 0 : index
    %c0_3 = arith.constant 0 : index
    %3 = vector.load %arg5[%c0_2, %c0_3] : memref<16x372xf32, #tpu.memory_space<vmem>>, vector<16x372xf32>
    tpu.vector_store %arg5[%c0_2, %c0_3], %2 {strides = array<i32>} : memref<16x372xf32, #tpu.memory_space<vmem>>, vector<16x372xf32>,
    %c0_4 = arith.constant 0 : index
    %c0_5 = arith.constant 0 : index
    %4 = vector.load %arg2[%c0_4, %c0_5] : memref<32x816xf32, #tpu.memory_space<vmem>>, vector<8x9xf32>
    %c0_6 = arith.constant 0 : index
    %c9 = arith.constant 9 : index
    %5 = vector.load %arg2[%c0_6, %c9] : memref<32x816xf32, #tpu.memory_space<vmem>>, vector<8x1xf32>
    %c0_7 = arith.constant 0 : index
    %c392 = arith.constant 392 : index
    %6 = vector.load %arg2[%c0_7, %c392] : memref<32x816xf32, #tpu.memory_space<vmem>>, vector<1x324xf32>
    %cst_8 = arith.constant 0.000000e+00 : f32
    %7 = vector.broadcast %cst_8 : f32 to vector<8x324xf32>
    %8 = vector.extract_strided_slice %4 {offsets = [0, 0], sizes = [8, 1], strides = [1, 1]} : vector<8x9xf32> to vector<8x1xf32>
    %c0_9 = arith.constant 0 : index
    %c0_10 = arith.constant 0 : index
    %c5 = arith.constant 5 : index
    %9 = vector.load %arg1[%c0_9, %c0_10, %c5] : memref<1x1x372xf32, #tpu.memory_space<vmem>>, vector<1x1x324xf32>
    %10 = vector.shape_cast %9 : vector<1x1x324xf32> to vector<1x324xf32>
    %11 = vector.broadcast %8 : vector<8x1xf32> to vector<8x324xf32>
    %12 = vector.broadcast %10 : vector<1x324xf32> to vector<8x324xf32>
    %13 = arith.mulf %11, %12 : vector<8x324xf32>
    %14 = arith.addf %7, %13 : vector<8x324xf32>
    %15 = vector.extract_strided_slice %4 {offsets = [0, 1], sizes = [8, 1], strides = [1, 1]} : vector<8x9xf32> to vector<8x1xf32>
    %c0_11 = arith.constant 0 : index
    %c0_12 = arith.constant 0 : index
    %c6 = arith.constant 6 : index
    %16 = vector.load %arg1[%c0_11, %c0_12, %c6] : memref<1x1x372xf32, #tpu.memory_space<vmem>>, vector<1x1x324xf32>
    %17 = vector.shape_cast %16 : vector<1x1x324xf32> to vector<1x324xf32>
    %18 = vector.broadcast %15 : vector<8x1xf32> to vector<8x324xf32>
    %19 = vector.broadcast %17 : vector<1x324xf32> to vector<8x324xf32>
    %20 = arith.mulf %18, %19 : vector<8x324xf32>
    %21 = arith.addf %14, %20 : vector<8x324xf32>
    %22 = vector.extract_strided_slice %4 {offsets = [0, 2], sizes = [8, 1], strides = [1, 1]} : vector<8x9xf32> to vector<8x1xf32>
    %c0_13 = arith.constant 0 : index
    %c0_14 = arith.constant 0 : index
    %c7 = arith.constant 7 : index
    %23 = vector.load %arg1[%c0_13, %c0_14, %c7] : memref<1x1x372xf32, #tpu.memory_space<vmem>>, vector<1x1x324xf32>
    %24 = vector.shape_cast %23 : vector<1x1x324xf32> to vector<1x324xf32>
    %25 = vector.broadcast %22 : vector<8x1xf32> to vector<8x324xf32>
    %26 = vector.broadcast %24 : vector<1x324xf32> to vector<8x324xf32>
    %27 = arith.mulf %25, %26 : vector<8x324xf32>
    %28 = arith.addf %21, %27 : vector<8x324xf32>
    %29 = vector.extract_strided_slice %4 {offsets = [0, 3], sizes = [8, 1], strides = [1, 1]} : vector<8x9xf32> to vector<8x1xf32>
    %c0_15 = arith.constant 0 : index
    %c0_16 = arith.constant 0 : index
    %c23 = arith.constant 23 : index
    %30 = vector.load %arg1[%c0_15, %c0_16, %c23] : memref<1x1x372xf32, #tpu.memory_space<vmem>>, vector<1x1x324xf32>
    %31 = vector.shape_cast %30 : vector<1x1x324xf32> to vector<1x324xf32>
    %32 = vector.broadcast %29 : vector<8x1xf32> to vector<8x324xf32>
    %33 = vector.broadcast %31 : vector<1x324xf32> to vector<8x324xf32>
    %34 = arith.mulf %32, %33 : vector<8x324xf32>
    %35 = arith.addf %28, %34 : vector<8x324xf32>
    %36 = vector.extract_strided_slice %4 {offsets = [0, 4], sizes = [8, 1], strides = [1, 1]} : vector<8x9xf32> to vector<8x1xf32>
    %c0_17 = arith.constant 0 : index
    %c0_18 = arith.constant 0 : index
    %c24 = arith.constant 24 : index
    %37 = vector.load %arg1[%c0_17, %c0_18, %c24] : memref<1x1x372xf32, #tpu.memory_space<vmem>>, vector<1x1x324xf32>
    %38 = vector.shape_cast %37 : vector<1x1x324xf32> to vector<1x324xf32>
    %39 = vector.broadcast %36 : vector<8x1xf32> to vector<8x324xf32>
    %40 = vector.broadcast %38 : vector<1x324xf32> to vector<8x324xf32>
    %41 = arith.mulf %39, %40 : vector<8x324xf32>
    %42 = arith.addf %35, %41 : vector<8x324xf32>
    %43 = vector.extract_strided_slice %4 {offsets = [0, 5], sizes = [8, 1], strides = [1, 1]} : vector<8x9xf32> to vector<8x1xf32>
    %c0_19 = arith.constant 0 : index
    %c0_20 = arith.constant 0 : index
    %c25 = arith.constant 25 : index
    %44 = vector.load %arg1[%c0_19, %c0_20, %c25] : memref<1x1x372xf32, #tpu.memory_space<vmem>>, vector<1x1x324xf32>
    %45 = vector.shape_cast %44 : vector<1x1x324xf32> to vector<1x324xf32>
    %46 = vector.broadcast %43 : vector<8x1xf32> to vector<8x324xf32>
    %47 = vector.broadcast %45 : vector<1x324xf32> to vector<8x324xf32>
    %48 = arith.mulf %46, %47 : vector<8x324xf32>
    %49 = arith.addf %42, %48 : vector<8x324xf32>
    %50 = vector.extract_strided_slice %4 {offsets = [0, 6], sizes = [8, 1], strides = [1, 1]} : vector<8x9xf32> to vector<8x1xf32>
    %c0_21 = arith.constant 0 : index
    %c0_22 = arith.constant 0 : index
    %c41 = arith.constant 41 : index
    %51 = vector.load %arg1[%c0_21, %c0_22, %c41] : memref<1x1x372xf32, #tpu.memory_space<vmem>>, vector<1x1x324xf32>
    %52 = vector.shape_cast %51 : vector<1x1x324xf32> to vector<1x324xf32>
    %53 = vector.broadcast %50 : vector<8x1xf32> to vector<8x324xf32>
    %54 = vector.broadcast %52 : vector<1x324xf32> to vector<8x324xf32>
    %55 = arith.mulf %53, %54 : vector<8x324xf32>
    %56 = arith.addf %49, %55 : vector<8x324xf32>
    %57 = vector.extract_strided_slice %4 {offsets = [0, 7], sizes = [8, 1], strides = [1, 1]} : vector<8x9xf32> to vector<8x1xf32>
    %c0_23 = arith.constant 0 : index
    %c0_24 = arith.constant 0 : index
    %c42 = arith.constant 42 : index
    %58 = vector.load %arg1[%c0_23, %c0_24, %c42] : memref<1x1x372xf32, #tpu.memory_space<vmem>>, vector<1x1x324xf32>
    %59 = vector.shape_cast %58 : vector<1x1x324xf32> to vector<1x324xf32>
    %60 = vector.broadcast %57 : vector<8x1xf32> to vector<8x324xf32>
    %61 = vector.broadcast %59 : vector<1x324xf32> to vector<8x324xf32>
    %62 = arith.mulf %60, %61 : vector<8x324xf32>
    %63 = arith.addf %56, %62 : vector<8x324xf32>
    %64 = vector.extract_strided_slice %4 {offsets = [0, 8], sizes = [8, 1], strides = [1, 1]} : vector<8x9xf32> to vector<8x1xf32>
    %c0_25 = arith.constant 0 : index
    %c0_26 = arith.constant 0 : index
    %c43 = arith.constant 43 : index
    %65 = vector.load %arg1[%c0_25, %c0_26, %c43] : memref<1x1x372xf32, #tpu.memory_space<vmem>>, vector<1x1x324xf32>
    %66 = vector.shape_cast %65 : vector<1x1x324xf32> to vector<1x324xf32>
    %67 = vector.broadcast %64 : vector<8x1xf32> to vector<8x324xf32>
    %68 = vector.broadcast %66 : vector<1x324xf32> to vector<8x324xf32>
    %69 = arith.mulf %67, %68 : vector<8x324xf32>
    %70 = arith.addf %63, %69 : vector<8x324xf32>
    %71 = vector.broadcast %5 : vector<8x1xf32> to vector<8x324xf32>
    %72 = arith.addf %70, %71 : vector<8x324xf32>
    %cst_27 = arith.constant 0.000000e+00 : f32
    %73 = vector.broadcast %cst_27 : f32 to vector<8x324xf32>
    %74 = arith.maximumf %72, %73 : vector<8x324xf32>
    %cst_28 = arith.constant 5.000000e-01 : f32
    %75 = vector.broadcast %cst_28 : f32 to vector<1x324xf32>
    %76 = arith.cmpf ogt, %6, %75 : vector<1x324xf32>
    %cst_29 = arith.constant 0.000000e+00 : f32
    %77 = vector.shape_cast %76 : vector<1x324xi1> to vector<1x324xi1>
    %78 = vector.broadcast %77 : vector<1x324xi1> to vector<8x324xi1>
    %79 = vector.broadcast %cst_29 : f32 to vector<8x324xf32>
    %80 = arith.select %78, %74, %79 : vector<8x324xi1>, vector<8x324xf32>
    %c0_30 = arith.constant 0 : index
    %c24_31 = arith.constant 24 : index
    %81 = vector.load %arg4[%c0_30, %c24_31] : memref<16x372xf32, #tpu.memory_space<vmem>>, vector<8x324xf32>
    tpu.vector_store %arg4[%c0_30, %c24_31], %80 {strides = array<i32>} : memref<16x372xf32, #tpu.memory_space<vmem>>, vector<8x324xf32>,
    %c0_32 = arith.constant 0 : index
    %c10 = arith.constant 10 : index
    %82 = vector.load %arg2[%c0_32, %c10] : memref<32x816xf32, #tpu.memory_space<vmem>>, vector<8x72xf32>
    %c0_33 = arith.constant 0 : index
    %c82 = arith.constant 82 : index
    %83 = vector.load %arg2[%c0_33, %c82] : memref<32x816xf32, #tpu.memory_space<vmem>>, vector<8x1xf32>
    %c0_34 = arith.constant 0 : index
    %c392_35 = arith.constant 392 : index
    %84 = vector.load %arg2[%c0_34, %c392_35] : memref<32x816xf32, #tpu.memory_space<vmem>>, vector<1x324xf32>
    %c0_36 = arith.constant 0 : index
    %c5_37 = arith.constant 5 : index
    %85 = vector.load %arg4[%c0_36, %c5_37] : memref<16x372xf32, #tpu.memory_space<vmem>>, vector<8x324xf32>
    %c0_38 = arith.constant 0 : index
    %c0_39 = arith.constant 0 : index
    %86 = vector.load %arg6[%c0_38, %c0_39] : memref<144x324xf32, #tpu.memory_space<vmem>>, vector<8x324xf32>
    tpu.vector_store %arg6[%c0_38, %c0_39], %85 {strides = array<i32>} : memref<144x324xf32, #tpu.memory_space<vmem>>, vector<8x324xf32>,
    %c0_40 = arith.constant 0 : index
    %c6_41 = arith.constant 6 : index
    %87 = vector.load %arg4[%c0_40, %c6_41] : memref<16x372xf32, #tpu.memory_space<vmem>>, vector<8x324xf32>
    %c8 = arith.constant 8 : index
    %c0_42 = arith.constant 0 : index
    %88 = vector.load %arg6[%c8, %c0_42] : memref<144x324xf32, #tpu.memory_space<vmem>>, vector<8x324xf32>
    tpu.vector_store %arg6[%c8, %c0_42], %87 {strides = array<i32>} : memref<144x324xf32, #tpu.memory_space<vmem>>, vector<8x324xf32>,
    %c0_43 = arith.constant 0 : index
    %c7_44 = arith.constant 7 : index
    %89 = vector.load %arg4[%c0_43, %c7_44] : memref<16x372xf32, #tpu.memory_space<vmem>>, vector<8x324xf32>
    %c16 = arith.constant 16 : index
    %c0_45 = arith.constant 0 : index
    %90 = vector.load %arg6[%c16, %c0_45] : memref<144x324xf32, #tpu.memory_space<vmem>>, vector<8x324xf32>
    tpu.vector_store %arg6[%c16, %c0_45], %89 {strides = array<i32>} : memref<144x324xf32, #tpu.memory_space<vmem>>, vector<8x324xf32>,
    %c0_46 = arith.constant 0 : index
    %c23_47 = arith.constant 23 : index
    %91 = vector.load %arg4[%c0_46, %c23_47] : memref<16x372xf32, #tpu.memory_space<vmem>>, vector<8x324xf32>
    %c24_48 = arith.constant 24 : index
    %c0_49 = arith.constant 0 : index
    %92 = vector.load %arg6[%c24_48, %c0_49] : memref<144x324xf32, #tpu.memory_space<vmem>>, vector<8x324xf32>
    tpu.vector_store %arg6[%c24_48, %c0_49], %91 {strides = array<i32>} : memref<144x324xf32, #tpu.memory_space<vmem>>, vector<8x324xf32>,
    %c0_50 = arith.constant 0 : index
    %c24_51 = arith.constant 24 : index
    %93 = vector.load %arg4[%c0_50, %c24_51] : memref<16x372xf32, #tpu.memory_space<vmem>>, vector<8x324xf32>
    %c32 = arith.constant 32 : index
    %c0_52 = arith.constant 0 : index
    %94 = vector.load %arg6[%c32, %c0_52] : memref<144x324xf32, #tpu.memory_space<vmem>>, vector<8x324xf32>
    tpu.vector_store %arg6[%c32, %c0_52], %93 {strides = array<i32>} : memref<144x324xf32, #tpu.memory_space<vmem>>, vector<8x324xf32>,
    %c0_53 = arith.constant 0 : index
    %c25_54 = arith.constant 25 : index
    %95 = vector.load %arg4[%c0_53, %c25_54] : memref<16x372xf32, #tpu.memory_space<vmem>>, vector<8x324xf32>
    %c40 = arith.constant 40 : index
    %c0_55 = arith.constant 0 : index
    %96 = vector.load %arg6[%c40, %c0_55] : memref<144x324xf32, #tpu.memory_space<vmem>>, vector<8x324xf32>
    tpu.vector_store %arg6[%c40, %c0_55], %95 {strides = array<i32>} : memref<144x324xf32, #tpu.memory_space<vmem>>, vector<8x324xf32>,
    %c0_56 = arith.constant 0 : index
    %c41_57 = arith.constant 41 : index
    %97 = vector.load %arg4[%c0_56, %c41_57] : memref<16x372xf32, #tpu.memory_space<vmem>>, vector<8x324xf32>
    %c48 = arith.constant 48 : index
    %c0_58 = arith.constant 0 : index
    %98 = vector.load %arg6[%c48, %c0_58] : memref<144x324xf32, #tpu.memory_space<vmem>>, vector<8x324xf32>
    tpu.vector_store %arg6[%c48, %c0_58], %97 {strides = array<i32>} : memref<144x324xf32, #tpu.memory_space<vmem>>, vector<8x324xf32>,
    %c0_59 = arith.constant 0 : index
    %c42_60 = arith.constant 42 : index
    %99 = vector.load %arg4[%c0_59, %c42_60] : memref<16x372xf32, #tpu.memory_space<vmem>>, vector<8x324xf32>
    %c56 = arith.constant 56 : index
    %c0_61 = arith.constant 0 : index
    %100 = vector.load %arg6[%c56, %c0_61] : memref<144x324xf32, #tpu.memory_space<vmem>>, vector<8x324xf32>
    tpu.vector_store %arg6[%c56, %c0_61], %99 {strides = array<i32>} : memref<144x324xf32, #tpu.memory_space<vmem>>, vector<8x324xf32>,
    %c0_62 = arith.constant 0 : index
    %c43_63 = arith.constant 43 : index
    %101 = vector.load %arg4[%c0_62, %c43_63] : memref<16x372xf32, #tpu.memory_space<vmem>>, vector<8x324xf32>
    %c64 = arith.constant 64 : index
    %c0_64 = arith.constant 0 : index
    %102 = vector.load %arg6[%c64, %c0_64] : memref<144x324xf32, #tpu.memory_space<vmem>>, vector<8x324xf32>
    tpu.vector_store %arg6[%c64, %c0_64], %101 {strides = array<i32>} : memref<144x324xf32, #tpu.memory_space<vmem>>, vector<8x324xf32>,
    %c0_65 = arith.constant 0 : index
    %c0_66 = arith.constant 0 : index
    %103 = vector.load %arg6[%c0_65, %c0_66] : memref<144x324xf32, #tpu.memory_space<vmem>>, vector<72x324xf32>
    %cst_67 = arith.constant dense<0.000000e+00> : vector<8x324xf32>
    %104 = tpu.matmul %82, %103, %cst_67 {dimension_numbers = #tpu.dot_dimension_numbers<[1], [0], [0], [1], [0, 0, 1, 1], [], []>} : vector<8x72xf32>, vector<72x324xf32>, vector<8x324xf32> -> vector<8x324xf32>
    %105 = vector.broadcast %83 : vector<8x1xf32> to vector<8x324xf32>
    %106 = arith.addf %104, %105 : vector<8x324xf32>
    %cst_68 = arith.constant 0.000000e+00 : f32
    %107 = vector.broadcast %cst_68 : f32 to vector<8x324xf32>
    %108 = arith.maximumf %106, %107 : vector<8x324xf32>
    %cst_69 = arith.constant 5.000000e-01 : f32
    %109 = vector.broadcast %cst_69 : f32 to vector<1x324xf32>
    %110 = arith.cmpf ogt, %84, %109 : vector<1x324xf32>
    %cst_70 = arith.constant 0.000000e+00 : f32
    %111 = vector.shape_cast %110 : vector<1x324xi1> to vector<1x324xi1>
    %112 = vector.broadcast %111 : vector<1x324xi1> to vector<8x324xi1>
    %113 = vector.broadcast %cst_70 : f32 to vector<8x324xf32>
    %114 = arith.select %112, %108, %113 : vector<8x324xi1>, vector<8x324xf32>
    %c0_71 = arith.constant 0 : index
    %c24_72 = arith.constant 24 : index
    %115 = vector.load %arg5[%c0_71, %c24_72] : memref<16x372xf32, #tpu.memory_space<vmem>>, vector<8x324xf32>
    tpu.vector_store %arg5[%c0_71, %c24_72], %114 {strides = array<i32>} : memref<16x372xf32, #tpu.memory_space<vmem>>, vector<8x324xf32>,
    %c0_73 = arith.constant 0 : index
    %c384 = arith.constant 384 : index
    %116 = vector.load %arg2[%c0_73, %c384] : memref<32x816xf32, #tpu.memory_space<vmem>>, vector<16x8xf32>
    %cst_74 = arith.constant 0.000000e+00 : f32
    %117 = vector.broadcast %cst_74 : f32 to vector<16x100xf32>
    %c0_75 = arith.constant 0 : index
    %c24_76 = arith.constant 24 : index
    %118 = vector.load %arg4[%c0_75, %c24_76] : memref<16x372xf32, #tpu.memory_space<vmem>>, vector<16x100xf32>
    tpu.vector_store %arg4[%c0_75, %c24_76], %117 {strides = array<i32>} : memref<16x372xf32, #tpu.memory_space<vmem>>, vector<16x100xf32>,
    %c0_77 = arith.constant 0 : index
    %c43_78 = arith.constant 43 : index
    %119 = vector.load %arg5[%c0_77, %c43_78] : memref<16x372xf32, #tpu.memory_space<vmem>>, vector<8x16xf32>
    %c0_79 = arith.constant 0 : index
    %c61 = arith.constant 61 : index
    %120 = vector.load %arg5[%c0_79, %c61] : memref<16x372xf32, #tpu.memory_space<vmem>>, vector<8x16xf32>
    %121 = arith.addf %119, %120 : vector<8x16xf32>
    %cst_80 = arith.constant dense<0.000000e+00> : vector<8x8xf32>
    %122 = tpu.matmul %121, %116, %cst_80 {dimension_numbers = #tpu.dot_dimension_numbers<[1], [0], [0], [1], [0, 0, 1, 1], [], []>} : vector<8x16xf32>, vector<16x8xf32>, vector<8x8xf32> -> vector<8x8xf32>
    %c0_81 = arith.constant 0 : index
    %c35 = arith.constant 35 : index
    %123 = vector.load %arg4[%c0_81, %c35] : memref<16x372xf32, #tpu.memory_space<vmem>>, vector<8x8xf32>
    tpu.vector_store %arg4[%c0_81, %c35], %122 {strides = array<i32>} : memref<16x372xf32, #tpu.memory_space<vmem>>, vector<8x8xf32>,
    %c0_82 = arith.constant 0 : index
    %c79 = arith.constant 79 : index
    %124 = vector.load %arg5[%c0_82, %c79] : memref<16x372xf32, #tpu.memory_space<vmem>>, vector<8x16xf32>
    %c0_83 = arith.constant 0 : index
    %c97 = arith.constant 97 : index
    %125 = vector.load %arg5[%c0_83, %c97] : memref<16x372xf32, #tpu.memory_space<vmem>>, vector<8x16xf32>
    %126 = arith.addf %124, %125 : vector<8x16xf32>
    %cst_84 = arith.constant dense<0.000000e+00> : vector<8x8xf32>
    %127 = tpu.matmul %126, %116, %cst_84 {dimension_numbers = #tpu.dot_dimension_numbers<[1], [0], [0], [1], [0, 0, 1, 1], [], []>} : vector<8x16xf32>, vector<16x8xf32>, vector<8x8xf32> -> vector<8x8xf32>
    %c0_85 = arith.constant 0 : index
    %c45 = arith.constant 45 : index
    %128 = vector.load %arg4[%c0_85, %c45] : memref<16x372xf32, #tpu.memory_space<vmem>>, vector<8x8xf32>
    tpu.vector_store %arg4[%c0_85, %c45], %127 {strides = array<i32>} : memref<16x372xf32, #tpu.memory_space<vmem>>, vector<8x8xf32>,
    %c0_86 = arith.constant 0 : index
    %c115 = arith.constant 115 : index
    %129 = vector.load %arg5[%c0_86, %c115] : memref<16x372xf32, #tpu.memory_space<vmem>>, vector<8x16xf32>
    %c0_87 = arith.constant 0 : index
    %c133 = arith.constant 133 : index
    %130 = vector.load %arg5[%c0_87, %c133] : memref<16x372xf32, #tpu.memory_space<vmem>>, vector<8x16xf32>
    %131 = arith.addf %129, %130 : vector<8x16xf32>
    %cst_88 = arith.constant dense<0.000000e+00> : vector<8x8xf32>
    %132 = tpu.matmul %131, %116, %cst_88 {dimension_numbers = #tpu.dot_dimension_numbers<[1], [0], [0], [1], [0, 0, 1, 1], [], []>} : vector<8x16xf32>, vector<16x8xf32>, vector<8x8xf32> -> vector<8x8xf32>
    %c0_89 = arith.constant 0 : index
    %c55 = arith.constant 55 : index
    %133 = vector.load %arg4[%c0_89, %c55] : memref<16x372xf32, #tpu.memory_space<vmem>>, vector<8x8xf32>
    tpu.vector_store %arg4[%c0_89, %c55], %132 {strides = array<i32>} : memref<16x372xf32, #tpu.memory_space<vmem>>, vector<8x8xf32>,
    %c0_90 = arith.constant 0 : index
    %c151 = arith.constant 151 : index
    %134 = vector.load %arg5[%c0_90, %c151] : memref<16x372xf32, #tpu.memory_space<vmem>>, vector<8x16xf32>
    %c0_91 = arith.constant 0 : index
    %c169 = arith.constant 169 : index
    %135 = vector.load %arg5[%c0_91, %c169] : memref<16x372xf32, #tpu.memory_space<vmem>>, vector<8x16xf32>
    %136 = arith.addf %134, %135 : vector<8x16xf32>
    %cst_92 = arith.constant dense<0.000000e+00> : vector<8x8xf32>
    %137 = tpu.matmul %136, %116, %cst_92 {dimension_numbers = #tpu.dot_dimension_numbers<[1], [0], [0], [1], [0, 0, 1, 1], [], []>} : vector<8x16xf32>, vector<16x8xf32>, vector<8x8xf32> -> vector<8x8xf32>
    %c0_93 = arith.constant 0 : index
    %c65 = arith.constant 65 : index
    %138 = vector.load %arg4[%c0_93, %c65] : memref<16x372xf32, #tpu.memory_space<vmem>>, vector<8x8xf32>
    tpu.vector_store %arg4[%c0_93, %c65], %137 {strides = array<i32>} : memref<16x372xf32, #tpu.memory_space<vmem>>, vector<8x8xf32>,
    %c0_94 = arith.constant 0 : index
    %c187 = arith.constant 187 : index
    %139 = vector.load %arg5[%c0_94, %c187] : memref<16x372xf32, #tpu.memory_space<vmem>>, vector<8x16xf32>
    %c0_95 = arith.constant 0 : index
    %c205 = arith.constant 205 : index
    %140 = vector.load %arg5[%c0_95, %c205] : memref<16x372xf32, #tpu.memory_space<vmem>>, vector<8x16xf32>
    %141 = arith.addf %139, %140 : vector<8x16xf32>
    %cst_96 = arith.constant dense<0.000000e+00> : vector<8x8xf32>
    %142 = tpu.matmul %141, %116, %cst_96 {dimension_numbers = #tpu.dot_dimension_numbers<[1], [0], [0], [1], [0, 0, 1, 1], [], []>} : vector<8x16xf32>, vector<16x8xf32>, vector<8x8xf32> -> vector<8x8xf32>
    %c0_97 = arith.constant 0 : index
    %c75 = arith.constant 75 : index
    %143 = vector.load %arg4[%c0_97, %c75] : memref<16x372xf32, #tpu.memory_space<vmem>>, vector<8x8xf32>
    tpu.vector_store %arg4[%c0_97, %c75], %142 {strides = array<i32>} : memref<16x372xf32, #tpu.memory_space<vmem>>, vector<8x8xf32>,
    %c0_98 = arith.constant 0 : index
    %c223 = arith.constant 223 : index
    %144 = vector.load %arg5[%c0_98, %c223] : memref<16x372xf32, #tpu.memory_space<vmem>>, vector<8x16xf32>
    %c0_99 = arith.constant 0 : index
    %c241 = arith.constant 241 : index
    %145 = vector.load %arg5[%c0_99, %c241] : memref<16x372xf32, #tpu.memory_space<vmem>>, vector<8x16xf32>
    %146 = arith.addf %144, %145 : vector<8x16xf32>
    %cst_100 = arith.constant dense<0.000000e+00> : vector<8x8xf32>
    %147 = tpu.matmul %146, %116, %cst_100 {dimension_numbers = #tpu.dot_dimension_numbers<[1], [0], [0], [1], [0, 0, 1, 1], [], []>} : vector<8x16xf32>, vector<16x8xf32>, vector<8x8xf32> -> vector<8x8xf32>
    %c0_101 = arith.constant 0 : index
    %c85 = arith.constant 85 : index
    %148 = vector.load %arg4[%c0_101, %c85] : memref<16x372xf32, #tpu.memory_space<vmem>>, vector<8x8xf32>
    tpu.vector_store %arg4[%c0_101, %c85], %147 {strides = array<i32>} : memref<16x372xf32, #tpu.memory_space<vmem>>, vector<8x8xf32>,
    %c0_102 = arith.constant 0 : index
    %c259 = arith.constant 259 : index
    %149 = vector.load %arg5[%c0_102, %c259] : memref<16x372xf32, #tpu.memory_space<vmem>>, vector<8x16xf32>
    %c0_103 = arith.constant 0 : index
    %c277 = arith.constant 277 : index
    %150 = vector.load %arg5[%c0_103, %c277] : memref<16x372xf32, #tpu.memory_space<vmem>>, vector<8x16xf32>
    %151 = arith.addf %149, %150 : vector<8x16xf32>
    %cst_104 = arith.constant dense<0.000000e+00> : vector<8x8xf32>
    %152 = tpu.matmul %151, %116, %cst_104 {dimension_numbers = #tpu.dot_dimension_numbers<[1], [0], [0], [1], [0, 0, 1, 1], [], []>} : vector<8x16xf32>, vector<16x8xf32>, vector<8x8xf32> -> vector<8x8xf32>
    %c0_105 = arith.constant 0 : index
    %c95 = arith.constant 95 : index
    %153 = vector.load %arg4[%c0_105, %c95] : memref<16x372xf32, #tpu.memory_space<vmem>>, vector<8x8xf32>
    tpu.vector_store %arg4[%c0_105, %c95], %152 {strides = array<i32>} : memref<16x372xf32, #tpu.memory_space<vmem>>, vector<8x8xf32>,
    %c0_106 = arith.constant 0 : index
    %c295 = arith.constant 295 : index
    %154 = vector.load %arg5[%c0_106, %c295] : memref<16x372xf32, #tpu.memory_space<vmem>>, vector<8x16xf32>
    %c0_107 = arith.constant 0 : index
    %c313 = arith.constant 313 : index
    %155 = vector.load %arg5[%c0_107, %c313] : memref<16x372xf32, #tpu.memory_space<vmem>>, vector<8x16xf32>
    %156 = arith.addf %154, %155 : vector<8x16xf32>
    %cst_108 = arith.constant dense<0.000000e+00> : vector<8x8xf32>
    %157 = tpu.matmul %156, %116, %cst_108 {dimension_numbers = #tpu.dot_dimension_numbers<[1], [0], [0], [1], [0, 0, 1, 1], [], []>} : vector<8x16xf32>, vector<16x8xf32>, vector<8x8xf32> -> vector<8x8xf32>
    %c0_109 = arith.constant 0 : index
    %c105 = arith.constant 105 : index
    %158 = vector.load %arg4[%c0_109, %c105] : memref<16x372xf32, #tpu.memory_space<vmem>>, vector<8x8xf32>
    tpu.vector_store %arg4[%c0_109, %c105], %157 {strides = array<i32>} : memref<16x372xf32, #tpu.memory_space<vmem>>, vector<8x8xf32>,
    %c0_110 = arith.constant 0 : index
    %c83 = arith.constant 83 : index
    %159 = vector.load %arg2[%c0_110, %c83] : memref<32x816xf32, #tpu.memory_space<vmem>>, vector<16x72xf32>
    %c0_111 = arith.constant 0 : index
    %c155 = arith.constant 155 : index
    %160 = vector.load %arg2[%c0_111, %c155] : memref<32x816xf32, #tpu.memory_space<vmem>>, vector<16x1xf32>
    %c0_112 = arith.constant 0 : index
    %c716 = arith.constant 716 : index
    %161 = vector.load %arg2[%c0_112, %c716] : memref<32x816xf32, #tpu.memory_space<vmem>>, vector<1x100xf32>
    %c0_113 = arith.constant 0 : index
    %c13 = arith.constant 13 : index
    %162 = vector.load %arg4[%c0_113, %c13] : memref<16x372xf32, #tpu.memory_space<vmem>>, vector<8x100xf32>
    %c0_114 = arith.constant 0 : index
    %c0_115 = arith.constant 0 : index
    %163 = vector.load %arg6[%c0_114, %c0_115] : memref<144x324xf32, #tpu.memory_space<vmem>>, vector<8x100xf32>
    tpu.vector_store %arg6[%c0_114, %c0_115], %162 {strides = array<i32>} : memref<144x324xf32, #tpu.memory_space<vmem>>, vector<8x100xf32>,
    %c0_116 = arith.constant 0 : index
    %c14 = arith.constant 14 : index
    %164 = vector.load %arg4[%c0_116, %c14] : memref<16x372xf32, #tpu.memory_space<vmem>>, vector<8x100xf32>
    %c8_117 = arith.constant 8 : index
    %c0_118 = arith.constant 0 : index
    %165 = vector.load %arg6[%c8_117, %c0_118] : memref<144x324xf32, #tpu.memory_space<vmem>>, vector<8x100xf32>
    tpu.vector_store %arg6[%c8_117, %c0_118], %164 {strides = array<i32>} : memref<144x324xf32, #tpu.memory_space<vmem>>, vector<8x100xf32>,
    %c0_119 = arith.constant 0 : index
    %c15 = arith.constant 15 : index
    %166 = vector.load %arg4[%c0_119, %c15] : memref<16x372xf32, #tpu.memory_space<vmem>>, vector<8x100xf32>
    %c16_120 = arith.constant 16 : index
    %c0_121 = arith.constant 0 : index
    %167 = vector.load %arg6[%c16_120, %c0_121] : memref<144x324xf32, #tpu.memory_space<vmem>>, vector<8x100xf32>
    tpu.vector_store %arg6[%c16_120, %c0_121], %166 {strides = array<i32>} : memref<144x324xf32, #tpu.memory_space<vmem>>, vector<8x100xf32>,
    %c0_122 = arith.constant 0 : index
    %c23_123 = arith.constant 23 : index
    %168 = vector.load %arg4[%c0_122, %c23_123] : memref<16x372xf32, #tpu.memory_space<vmem>>, vector<8x100xf32>
    %c24_124 = arith.constant 24 : index
    %c0_125 = arith.constant 0 : index
    %169 = vector.load %arg6[%c24_124, %c0_125] : memref<144x324xf32, #tpu.memory_space<vmem>>, vector<8x100xf32>
    tpu.vector_store %arg6[%c24_124, %c0_125], %168 {strides = array<i32>} : memref<144x324xf32, #tpu.memory_space<vmem>>, vector<8x100xf32>,
    %c0_126 = arith.constant 0 : index
    %c24_127 = arith.constant 24 : index
    %170 = vector.load %arg4[%c0_126, %c24_127] : memref<16x372xf32, #tpu.memory_space<vmem>>, vector<8x100xf32>
    %c32_128 = arith.constant 32 : index
    %c0_129 = arith.constant 0 : index
    %171 = vector.load %arg6[%c32_128, %c0_129] : memref<144x324xf32, #tpu.memory_space<vmem>>, vector<8x100xf32>
    tpu.vector_store %arg6[%c32_128, %c0_129], %170 {strides = array<i32>} : memref<144x324xf32, #tpu.memory_space<vmem>>, vector<8x100xf32>,
    %c0_130 = arith.constant 0 : index
    %c25_131 = arith.constant 25 : index
    %172 = vector.load %arg4[%c0_130, %c25_131] : memref<16x372xf32, #tpu.memory_space<vmem>>, vector<8x100xf32>
    %c40_132 = arith.constant 40 : index
    %c0_133 = arith.constant 0 : index
    %173 = vector.load %arg6[%c40_132, %c0_133] : memref<144x324xf32, #tpu.memory_space<vmem>>, vector<8x100xf32>
    tpu.vector_store %arg6[%c40_132, %c0_133], %172 {strides = array<i32>} : memref<144x324xf32, #tpu.memory_space<vmem>>, vector<8x100xf32>,
    %c0_134 = arith.constant 0 : index
    %c33 = arith.constant 33 : index
    %174 = vector.load %arg4[%c0_134, %c33] : memref<16x372xf32, #tpu.memory_space<vmem>>, vector<8x100xf32>
    %c48_135 = arith.constant 48 : index
    %c0_136 = arith.constant 0 : index
    %175 = vector.load %arg6[%c48_135, %c0_136] : memref<144x324xf32, #tpu.memory_space<vmem>>, vector<8x100xf32>
    tpu.vector_store %arg6[%c48_135, %c0_136], %174 {strides = array<i32>} : memref<144x324xf32, #tpu.memory_space<vmem>>, vector<8x100xf32>,
    %c0_137 = arith.constant 0 : index
    %c34 = arith.constant 34 : index
    %176 = vector.load %arg4[%c0_137, %c34] : memref<16x372xf32, #tpu.memory_space<vmem>>, vector<8x100xf32>
    %c56_138 = arith.constant 56 : index
    %c0_139 = arith.constant 0 : index
    %177 = vector.load %arg6[%c56_138, %c0_139] : memref<144x324xf32, #tpu.memory_space<vmem>>, vector<8x100xf32>
    tpu.vector_store %arg6[%c56_138, %c0_139], %176 {strides = array<i32>} : memref<144x324xf32, #tpu.memory_space<vmem>>, vector<8x100xf32>,
    %c0_140 = arith.constant 0 : index
    %c35_141 = arith.constant 35 : index
    %178 = vector.load %arg4[%c0_140, %c35_141] : memref<16x372xf32, #tpu.memory_space<vmem>>, vector<8x100xf32>
    %c64_142 = arith.constant 64 : index
    %c0_143 = arith.constant 0 : index
    %179 = vector.load %arg6[%c64_142, %c0_143] : memref<144x324xf32, #tpu.memory_space<vmem>>, vector<8x100xf32>
    tpu.vector_store %arg6[%c64_142, %c0_143], %178 {strides = array<i32>} : memref<144x324xf32, #tpu.memory_space<vmem>>, vector<8x100xf32>,
    %c0_144 = arith.constant 0 : index
    %c0_145 = arith.constant 0 : index
    %180 = vector.load %arg6[%c0_144, %c0_145] : memref<144x324xf32, #tpu.memory_space<vmem>>, vector<72x100xf32>
    %cst_146 = arith.constant dense<0.000000e+00> : vector<16x100xf32>
    %181 = tpu.matmul %159, %180, %cst_146 {dimension_numbers = #tpu.dot_dimension_numbers<[1], [0], [0], [1], [0, 0, 1, 1], [], []>} : vector<16x72xf32>, vector<72x100xf32>, vector<16x100xf32> -> vector<16x100xf32>
    %182 = vector.broadcast %160 : vector<16x1xf32> to vector<16x100xf32>
    %183 = arith.addf %181, %182 : vector<16x100xf32>
    %cst_147 = arith.constant 0.000000e+00 : f32
    %184 = vector.broadcast %cst_147 : f32 to vector<16x100xf32>
    %185 = arith.maximumf %183, %184 : vector<16x100xf32>
    %cst_148 = arith.constant 5.000000e-01 : f32
    %186 = vector.broadcast %cst_148 : f32 to vector<1x100xf32>
    %187 = arith.cmpf ogt, %161, %186 : vector<1x100xf32>
    %cst_149 = arith.constant 0.000000e+00 : f32
    %188 = vector.shape_cast %187 : vector<1x100xi1> to vector<1x100xi1>
    %189 = vector.broadcast %188 : vector<1x100xi1> to vector<16x100xi1>
    %190 = vector.broadcast %cst_149 : f32 to vector<16x100xf32>
    %191 = arith.select %189, %185, %190 : vector<16x100xi1>, vector<16x100xf32>
    %c0_150 = arith.constant 0 : index
    %c24_151 = arith.constant 24 : index
    %192 = vector.load %arg5[%c0_150, %c24_151] : memref<16x372xf32, #tpu.memory_space<vmem>>, vector<16x100xf32>
    tpu.vector_store %arg5[%c0_150, %c24_151], %191 {strides = array<i32>} : memref<16x372xf32, #tpu.memory_space<vmem>>, vector<16x100xf32>,
    %c0_152 = arith.constant 0 : index
    %c156 = arith.constant 156 : index
    %193 = vector.load %arg2[%c0_152, %c156] : memref<32x816xf32, #tpu.memory_space<vmem>>, vector<16x144xf32>
    %c0_153 = arith.constant 0 : index
    %c300 = arith.constant 300 : index
    %194 = vector.load %arg2[%c0_153, %c300] : memref<32x816xf32, #tpu.memory_space<vmem>>, vector<16x1xf32>
    %c0_154 = arith.constant 0 : index
    %c716_155 = arith.constant 716 : index
    %195 = vector.load %arg2[%c0_154, %c716_155] : memref<32x816xf32, #tpu.memory_space<vmem>>, vector<1x100xf32>
    %c0_156 = arith.constant 0 : index
    %c13_157 = arith.constant 13 : index
    %196 = vector.load %arg5[%c0_156, %c13_157] : memref<16x372xf32, #tpu.memory_space<vmem>>, vector<16x100xf32>
    %c0_158 = arith.constant 0 : index
    %c0_159 = arith.constant 0 : index
    %197 = vector.load %arg6[%c0_158, %c0_159] : memref<144x324xf32, #tpu.memory_space<vmem>>, vector<16x100xf32>
    tpu.vector_store %arg6[%c0_158, %c0_159], %196 {strides = array<i32>} : memref<144x324xf32, #tpu.memory_space<vmem>>, vector<16x100xf32>,
    %c0_160 = arith.constant 0 : index
    %c14_161 = arith.constant 14 : index
    %198 = vector.load %arg5[%c0_160, %c14_161] : memref<16x372xf32, #tpu.memory_space<vmem>>, vector<16x100xf32>
    %c16_162 = arith.constant 16 : index
    %c0_163 = arith.constant 0 : index
    %199 = vector.load %arg6[%c16_162, %c0_163] : memref<144x324xf32, #tpu.memory_space<vmem>>, vector<16x100xf32>
    tpu.vector_store %arg6[%c16_162, %c0_163], %198 {strides = array<i32>} : memref<144x324xf32, #tpu.memory_space<vmem>>, vector<16x100xf32>,
    %c0_164 = arith.constant 0 : index
    %c15_165 = arith.constant 15 : index
    %200 = vector.load %arg5[%c0_164, %c15_165] : memref<16x372xf32, #tpu.memory_space<vmem>>, vector<16x100xf32>
    %c32_166 = arith.constant 32 : index
    %c0_167 = arith.constant 0 : index
    %201 = vector.load %arg6[%c32_166, %c0_167] : memref<144x324xf32, #tpu.memory_space<vmem>>, vector<16x100xf32>
    tpu.vector_store %arg6[%c32_166, %c0_167], %200 {strides = array<i32>} : memref<144x324xf32, #tpu.memory_space<vmem>>, vector<16x100xf32>,
    %c0_168 = arith.constant 0 : index
    %c23_169 = arith.constant 23 : index
    %202 = vector.load %arg5[%c0_168, %c23_169] : memref<16x372xf32, #tpu.memory_space<vmem>>, vector<16x100xf32>
    %c48_170 = arith.constant 48 : index
    %c0_171 = arith.constant 0 : index
    %203 = vector.load %arg6[%c48_170, %c0_171] : memref<144x324xf32, #tpu.memory_space<vmem>>, vector<16x100xf32>
    tpu.vector_store %arg6[%c48_170, %c0_171], %202 {strides = array<i32>} : memref<144x324xf32, #tpu.memory_space<vmem>>, vector<16x100xf32>,
    %c0_172 = arith.constant 0 : index
    %c24_173 = arith.constant 24 : index
    %204 = vector.load %arg5[%c0_172, %c24_173] : memref<16x372xf32, #tpu.memory_space<vmem>>, vector<16x100xf32>
    %c64_174 = arith.constant 64 : index
    %c0_175 = arith.constant 0 : index
    %205 = vector.load %arg6[%c64_174, %c0_175] : memref<144x324xf32, #tpu.memory_space<vmem>>, vector<16x100xf32>
    tpu.vector_store %arg6[%c64_174, %c0_175], %204 {strides = array<i32>} : memref<144x324xf32, #tpu.memory_space<vmem>>, vector<16x100xf32>,
    %c0_176 = arith.constant 0 : index
    %c25_177 = arith.constant 25 : index
    %206 = vector.load %arg5[%c0_176, %c25_177] : memref<16x372xf32, #tpu.memory_space<vmem>>, vector<16x100xf32>
    %c80 = arith.constant 80 : index
    %c0_178 = arith.constant 0 : index
    %207 = vector.load %arg6[%c80, %c0_178] : memref<144x324xf32, #tpu.memory_space<vmem>>, vector<16x100xf32>
    tpu.vector_store %arg6[%c80, %c0_178], %206 {strides = array<i32>} : memref<144x324xf32, #tpu.memory_space<vmem>>, vector<16x100xf32>,
    %c0_179 = arith.constant 0 : index
    %c33_180 = arith.constant 33 : index
    %208 = vector.load %arg5[%c0_179, %c33_180] : memref<16x372xf32, #tpu.memory_space<vmem>>, vector<16x100xf32>
    %c96 = arith.constant 96 : index
    %c0_181 = arith.constant 0 : index
    %209 = vector.load %arg6[%c96, %c0_181] : memref<144x324xf32, #tpu.memory_space<vmem>>, vector<16x100xf32>
    tpu.vector_store %arg6[%c96, %c0_181], %208 {strides = array<i32>} : memref<144x324xf32, #tpu.memory_space<vmem>>, vector<16x100xf32>,
    %c0_182 = arith.constant 0 : index
    %c34_183 = arith.constant 34 : index
    %210 = vector.load %arg5[%c0_182, %c34_183] : memref<16x372xf32, #tpu.memory_space<vmem>>, vector<16x100xf32>
    %c112 = arith.constant 112 : index
    %c0_184 = arith.constant 0 : index
    %211 = vector.load %arg6[%c112, %c0_184] : memref<144x324xf32, #tpu.memory_space<vmem>>, vector<16x100xf32>
    tpu.vector_store %arg6[%c112, %c0_184], %210 {strides = array<i32>} : memref<144x324xf32, #tpu.memory_space<vmem>>, vector<16x100xf32>,
    %c0_185 = arith.constant 0 : index
    %c35_186 = arith.constant 35 : index
    %212 = vector.load %arg5[%c0_185, %c35_186] : memref<16x372xf32, #tpu.memory_space<vmem>>, vector<16x100xf32>
    %c128 = arith.constant 128 : index
    %c0_187 = arith.constant 0 : index
    %213 = vector.load %arg6[%c128, %c0_187] : memref<144x324xf32, #tpu.memory_space<vmem>>, vector<16x100xf32>
    tpu.vector_store %arg6[%c128, %c0_187], %212 {strides = array<i32>} : memref<144x324xf32, #tpu.memory_space<vmem>>, vector<16x100xf32>,
    %c0_188 = arith.constant 0 : index
    %c0_189 = arith.constant 0 : index
    %214 = vector.load %arg6[%c0_188, %c0_189] : memref<144x324xf32, #tpu.memory_space<vmem>>, vector<144x100xf32>
    %cst_190 = arith.constant dense<0.000000e+00> : vector<16x100xf32>
    %215 = tpu.matmul %193, %214, %cst_190 {dimension_numbers = #tpu.dot_dimension_numbers<[1], [0], [0], [1], [0, 0, 1, 1], [], []>} : vector<16x144xf32>, vector<144x100xf32>, vector<16x100xf32> -> vector<16x100xf32>
    %216 = vector.broadcast %194 : vector<16x1xf32> to vector<16x100xf32>
    %217 = arith.addf %215, %216 : vector<16x100xf32>
    %cst_191 = arith.constant 0.000000e+00 : f32
    %218 = vector.broadcast %cst_191 : f32 to vector<16x100xf32>
    %219 = arith.maximumf %217, %218 : vector<16x100xf32>
    %cst_192 = arith.constant 5.000000e-01 : f32
    %220 = vector.broadcast %cst_192 : f32 to vector<1x100xf32>
    %221 = arith.cmpf ogt, %195, %220 : vector<1x100xf32>
    %cst_193 = arith.constant 0.000000e+00 : f32
    %222 = vector.shape_cast %221 : vector<1x100xi1> to vector<1x100xi1>
    %223 = vector.broadcast %222 : vector<1x100xi1> to vector<16x100xi1>
    %224 = vector.broadcast %cst_193 : f32 to vector<16x100xf32>
    %225 = arith.select %223, %219, %224 : vector<16x100xi1>, vector<16x100xf32>
    %c0_194 = arith.constant 0 : index
    %c24_195 = arith.constant 24 : index
    %226 = vector.load %arg4[%c0_194, %c24_195] : memref<16x372xf32, #tpu.memory_space<vmem>>, vector<16x100xf32>
    tpu.vector_store %arg4[%c0_194, %c24_195], %225 {strides = array<i32>} : memref<16x372xf32, #tpu.memory_space<vmem>>, vector<16x100xf32>,
    %cst_196 = arith.constant 0.000000e+00 : f32
    %227 = vector.broadcast %cst_196 : f32 to vector<16x1xf32>
    %cst_197 = arith.constant 0xFF800000 : f32
    %228 = vector.broadcast %cst_197 : f32 to vector<16x1xf32>
    %c0_198 = arith.constant 0 : index
    %c35_199 = arith.constant 35 : index
    %229 = vector.load %arg4[%c0_198, %c35_199] : memref<16x372xf32, #tpu.memory_space<vmem>>, vector<16x8xf32>
    %c0_200 = arith.constant 0 : index
    %c45_201 = arith.constant 45 : index
    %230 = vector.load %arg4[%c0_200, %c45_201] : memref<16x372xf32, #tpu.memory_space<vmem>>, vector<16x8xf32>
    %231 = arith.addf %229, %230 : vector<16x8xf32>
    %cst_202 = arith.constant dense<0.000000e+00> : vector<16xf32>
    %232 = vector.multi_reduction <add>, %231, %cst_202 [1] : vector<16x8xf32> to vector<16xf32>
    %233 = vector.shape_cast %232 : vector<16xf32> to vector<16x1xf32>
    %cst_203 = arith.constant 6.250000e-02 : f32
    %234 = vector.broadcast %cst_203 : f32 to vector<16x1xf32>
    %235 = arith.mulf %233, %234 : vector<16x1xf32>
    %236 = arith.addf %227, %235 : vector<16x1xf32>
    %237 = arith.maximumf %228, %235 : vector<16x1xf32>
    %c0_204 = arith.constant 0 : index
    %c55_205 = arith.constant 55 : index
    %238 = vector.load %arg4[%c0_204, %c55_205] : memref<16x372xf32, #tpu.memory_space<vmem>>, vector<16x8xf32>
    %c0_206 = arith.constant 0 : index
    %c65_207 = arith.constant 65 : index
    %239 = vector.load %arg4[%c0_206, %c65_207] : memref<16x372xf32, #tpu.memory_space<vmem>>, vector<16x8xf32>
    %240 = arith.addf %238, %239 : vector<16x8xf32>
    %cst_208 = arith.constant dense<0.000000e+00> : vector<16xf32>
    %241 = vector.multi_reduction <add>, %240, %cst_208 [1] : vector<16x8xf32> to vector<16xf32>
    %242 = vector.shape_cast %241 : vector<16xf32> to vector<16x1xf32>
    %cst_209 = arith.constant 6.250000e-02 : f32
    %243 = vector.broadcast %cst_209 : f32 to vector<16x1xf32>
    %244 = arith.mulf %242, %243 : vector<16x1xf32>
    %245 = arith.addf %236, %244 : vector<16x1xf32>
    %246 = arith.maximumf %237, %244 : vector<16x1xf32>
    %c0_210 = arith.constant 0 : index
    %c75_211 = arith.constant 75 : index
    %247 = vector.load %arg4[%c0_210, %c75_211] : memref<16x372xf32, #tpu.memory_space<vmem>>, vector<16x8xf32>
    %c0_212 = arith.constant 0 : index
    %c85_213 = arith.constant 85 : index
    %248 = vector.load %arg4[%c0_212, %c85_213] : memref<16x372xf32, #tpu.memory_space<vmem>>, vector<16x8xf32>
    %249 = arith.addf %247, %248 : vector<16x8xf32>
    %cst_214 = arith.constant dense<0.000000e+00> : vector<16xf32>
    %250 = vector.multi_reduction <add>, %249, %cst_214 [1] : vector<16x8xf32> to vector<16xf32>
    %251 = vector.shape_cast %250 : vector<16xf32> to vector<16x1xf32>
    %cst_215 = arith.constant 6.250000e-02 : f32
    %252 = vector.broadcast %cst_215 : f32 to vector<16x1xf32>
    %253 = arith.mulf %251, %252 : vector<16x1xf32>
    %254 = arith.addf %245, %253 : vector<16x1xf32>
    %255 = arith.maximumf %246, %253 : vector<16x1xf32>
    %c0_216 = arith.constant 0 : index
    %c95_217 = arith.constant 95 : index
    %256 = vector.load %arg4[%c0_216, %c95_217] : memref<16x372xf32, #tpu.memory_space<vmem>>, vector<16x8xf32>
    %c0_218 = arith.constant 0 : index
    %c105_219 = arith.constant 105 : index
    %257 = vector.load %arg4[%c0_218, %c105_219] : memref<16x372xf32, #tpu.memory_space<vmem>>, vector<16x8xf32>
    %258 = arith.addf %256, %257 : vector<16x8xf32>
    %cst_220 = arith.constant dense<0.000000e+00> : vector<16xf32>
    %259 = vector.multi_reduction <add>, %258, %cst_220 [1] : vector<16x8xf32> to vector<16xf32>
    %260 = vector.shape_cast %259 : vector<16xf32> to vector<16x1xf32>
    %cst_221 = arith.constant 6.250000e-02 : f32
    %261 = vector.broadcast %cst_221 : f32 to vector<16x1xf32>
    %262 = arith.mulf %260, %261 : vector<16x1xf32>
    %263 = arith.addf %254, %262 : vector<16x1xf32>
    %264 = arith.maximumf %255, %262 : vector<16x1xf32>
    %cst_222 = arith.constant 2.500000e-01 : f32
    %265 = vector.broadcast %cst_222 : f32 to vector<16x1xf32>
    %266 = arith.mulf %263, %265 : vector<16x1xf32>
    %267 = arith.addf %264, %266 : vector<16x1xf32>
    %c0_223 = arith.constant 0 : index
    %c301 = arith.constant 301 : index
    %268 = vector.load %arg2[%c0_223, %c301] : memref<32x816xf32, #tpu.memory_space<vmem>>, vector<32x16xf32>
    %cst_224 = arith.constant dense<0.000000e+00> : vector<32x1xf32>
    %269 = tpu.matmul %268, %267, %cst_224 {dimension_numbers = #tpu.dot_dimension_numbers<[1], [0], [0], [1], [0, 0, 1, 1], [], []>} : vector<32x16xf32>, vector<16x1xf32>, vector<32x1xf32> -> vector<32x1xf32>
    %c0_225 = arith.constant 0 : index
    %c317 = arith.constant 317 : index
    %270 = vector.load %arg2[%c0_225, %c317] : memref<32x816xf32, #tpu.memory_space<vmem>>, vector<32x1xf32>
    %271 = arith.addf %269, %270 : vector<32x1xf32>
    %cst_226 = arith.constant 0.000000e+00 : f32
    %272 = vector.broadcast %cst_226 : f32 to vector<32x1xf32>
    %273 = arith.maximumf %271, %272 : vector<32x1xf32>
    %c0_227 = arith.constant 0 : index
    %c318 = arith.constant 318 : index
    %274 = vector.load %arg2[%c0_227, %c318] : memref<32x816xf32, #tpu.memory_space<vmem>>, vector<32x32xf32>
    %cst_228 = arith.constant dense<0.000000e+00> : vector<32x1xf32>
    %275 = tpu.matmul %274, %273, %cst_228 {dimension_numbers = #tpu.dot_dimension_numbers<[1], [0], [0], [1], [0, 0, 1, 1], [], []>} : vector<32x32xf32>, vector<32x1xf32>, vector<32x1xf32> -> vector<32x1xf32>
    %c0_229 = arith.constant 0 : index
    %c350 = arith.constant 350 : index
    %276 = vector.load %arg2[%c0_229, %c350] : memref<32x816xf32, #tpu.memory_space<vmem>>, vector<32x32xf32>
    %cst_230 = arith.constant 5.000000e-01 : f32
    %277 = vector.broadcast %cst_230 : f32 to vector<32x1xf32>
    %278 = arith.mulf %277, %275 : vector<32x1xf32>
    %cst_231 = arith.constant 4.471500e-02 : f32
    %279 = vector.broadcast %cst_231 : f32 to vector<32x1xf32>
    %280 = arith.mulf %279, %275 : vector<32x1xf32>
    %281 = arith.mulf %280, %275 : vector<32x1xf32>
    %282 = arith.mulf %281, %275 : vector<32x1xf32>
    %283 = arith.addf %275, %282 : vector<32x1xf32>
    %cst_232 = arith.constant 0.797884583 : f32
    %284 = vector.broadcast %cst_232 : f32 to vector<32x1xf32>
    %285 = arith.mulf %284, %283 : vector<32x1xf32>
    %286 = math.tanh %285 : vector<32x1xf32>
    %cst_233 = arith.constant 1.000000e+00 : f32
    %287 = vector.broadcast %cst_233 : f32 to vector<32x1xf32>
    %288 = arith.addf %287, %286 : vector<32x1xf32>
    %289 = arith.mulf %278, %288 : vector<32x1xf32>
    %cst_234 = arith.constant dense<0.000000e+00> : vector<32x1xf32>
    %290 = tpu.matmul %276, %289, %cst_234 {dimension_numbers = #tpu.dot_dimension_numbers<[1], [0], [0], [1], [0, 0, 1, 1], [], []>} : vector<32x32xf32>, vector<32x1xf32>, vector<32x1xf32> -> vector<32x1xf32>
    %291 = arith.addf %275, %290 : vector<32x1xf32>
    %cst_235 = arith.constant dense<0.000000e+00> : vector<1xf32>
    %292 = vector.multi_reduction <add>, %291, %cst_235 [0] : vector<32x1xf32> to vector<1xf32>
    %293 = vector.shape_cast %292 : vector<1xf32> to vector<1x1xf32>
    %cst_236 = arith.constant 3.200000e+01 : f32
    %294 = vector.broadcast %cst_236 : f32 to vector<1x1xf32>
    %295 = arith.divf %293, %294 : vector<1x1xf32>
    %296 = vector.broadcast %295 : vector<1x1xf32> to vector<32x1xf32>
    %297 = arith.subf %291, %296 : vector<32x1xf32>
    %298 = arith.mulf %297, %297 : vector<32x1xf32>
    %cst_237 = arith.constant dense<0.000000e+00> : vector<1xf32>
    %299 = vector.multi_reduction <add>, %298, %cst_237 [0] : vector<32x1xf32> to vector<1xf32>
    %300 = vector.shape_cast %299 : vector<1xf32> to vector<1x1xf32>
    %cst_238 = arith.constant 3.200000e+01 : f32
    %301 = vector.broadcast %cst_238 : f32 to vector<1x1xf32>
    %302 = arith.divf %300, %301 : vector<1x1xf32>
    %303 = vector.broadcast %295 : vector<1x1xf32> to vector<32x1xf32>
    %304 = arith.subf %291, %303 : vector<32x1xf32>
    %cst_239 = arith.constant 9.99999974E-6 : f32
    %305 = vector.broadcast %cst_239 : f32 to vector<1x1xf32>
    %306 = arith.addf %302, %305 : vector<1x1xf32>
    %307 = math.rsqrt %306 : vector<1x1xf32>
    %308 = vector.broadcast %307 : vector<1x1xf32> to vector<32x1xf32>
    %309 = arith.mulf %304, %308 : vector<32x1xf32>
    %c0_240 = arith.constant 0 : index
    %c382 = arith.constant 382 : index
    %310 = vector.load %arg2[%c0_240, %c382] : memref<32x816xf32, #tpu.memory_space<vmem>>, vector<32x1xf32>
    %311 = arith.mulf %309, %310 : vector<32x1xf32>
    %c0_241 = arith.constant 0 : index
    %c383 = arith.constant 383 : index
    %312 = vector.load %arg2[%c0_241, %c383] : memref<32x816xf32, #tpu.memory_space<vmem>>, vector<32x1xf32>
    %313 = arith.addf %311, %312 : vector<32x1xf32>
    %c0_242 = arith.constant 0 : index
    %c0_243 = arith.constant 0 : index
    %c0_244 = arith.constant 0 : index
    %314 = vector.load %arg3[%c0_242, %c0_243, %c0_244] : memref<1x32x1xf32, #tpu.memory_space<vmem>>, vector<1x32x1xf32>
    %315 = vector.shape_cast %314 : vector<1x32x1xf32> to vector<32x1xf32>
    %316 = vector.shape_cast %313 : vector<32x1xf32> to vector<1x32x1xf32>
    tpu.vector_store %arg3[%c0_242, %c0_243, %c0_244], %316 {strides = array<i32>} : memref<1x32x1xf32, #tpu.memory_space<vmem>>, vector<1x32x1xf32>,
    return
  }
  func.func @transform_0(%arg0: i32) -> (i32, i32, i32) {
    %c0_i32 = arith.constant 0 : i32
    %c0_i32_0 = arith.constant 0 : i32
    %c0_i32_1 = arith.constant 0 : i32
    return %arg0, %c0_i32, %c0_i32_0 : i32, i32, i32
  }
  func.func @transform_1(%arg0: i32) -> (i32, i32) {
    %c0_i32 = arith.constant 0 : i32
    %c0_i32_0 = arith.constant 0 : i32
    %c0_i32_1 = arith.constant 0 : i32
    return %c0_i32, %c0_i32_0 : i32, i32
  }
  func.func @transform_2(%arg0: i32) -> (i32, i32, i32) {
    %c0_i32 = arith.constant 0 : i32
    %c0_i32_0 = arith.constant 0 : i32
    %c0_i32_1 = arith.constant 0 : i32
    return %arg0, %c0_i32, %c0_i32_0 : i32, i32, i32
  }
}

</mosaic_0001>

<bundles_post_ra>
// kernel: custom_pengi_forward.1
= control target key start
LH: loop header
LB: loop body
LE: loop exit
PB: predicated region body
PF: predicated region fallthrough
CT: control target
= control target key end

     0   :  { %s3135_s9 = smov 0   ;;  %s3698_s0 = inlined_call_operand.vmem [shape: f32[2,1,372], index: 0, kind: input, shape index: {}]   ;;  %s3699_s1 = inlined_call_operand.vmem [shape: f32[32,816], index: 1, kind: input, shape index: {}]   ;;  %s3700_s2 = inlined_call_operand.vmem [shape: f32[2,32,1], index: 2, kind: output, shape index: {}]  }
   0x1 LB: > { %s2710_s10 = sadd.s32 4294967295, %s3055_s9   ;;  %p2714_p0 = scmp.ge.s32.totalorder %s3055_s9, 1  ;;  %s3055_s9 = sphi %s3135_s9, %s12_s9  }
   0x2   : > { %p111_p1 = scmp.lt.s32.totalorder %s3055_s9, 3 }
   0x4   : > { %p112_p2 = pnand %p2714_p0, %p111_p1 }
   0x5   : > { %p132_p3 = scmp.lt.s32.totalorder (!%p112_p2), %s2710_s10, 1  ;;  %s3067_s17 = smov (!%p112_p2), 127  }
   0x6   : > { %115 = sbr.rel (%p112_p2) target bundleno = 4028 (0xfbc), region = 28  ;;  %s3068_s18 = smov (!%p112_p2), 126  }
   0x7   : > { %s3069_s19 = smov (!%p112_p2), 110   ;;  %s3070_s20 = smov (!%p112_p2), 109  }
   0x8   : > { %s3071_s21 = smov (!%p112_p2), 108   ;;  %s3072_s22 = smov (!%p112_p2), 92  }
   0x9   : > { %s3073_s23 = smov (!%p112_p2), 91   ;;  %s3074_s24 = smov (!%p112_p2), 90  }
   0xa   : > { %s3076_s25 = smov (!%p112_p2), 3   ;;  %s3077_s28 = smov (!%p112_p2), 16  }
   0xb   : > { %v3146_v0 = vld [vmem:[%s3699_s1] sm:$0xff]  ;;  %v3057_v1 = vmov 1   ;;  %v3058_v2 = vmov 3   ;;  %v3059_v3 = vmov 2   ;;  %v3060_v4 = vmov 4   ;;  %s3702_s10 = smov (!%p132_p3, %s2710_s10), 1 }
   0xc   : > { %3023 = vset.pattern.permute.xlu0 %v3057_v1  ;;  %3025 = vset.pattern.permute.xlu1 %v3058_v2  ;;  %v3061_v5 = vmov 5   ;;  %v3062_v6 = vmov 6   ;;  %v3063_v7 = vmov 7   ;;  %v3064_v8 = vmov 0   ;;  %s2951_s13 = smul.u32 3, %s3702_s10  ;;  %s3078_s29 = smov 85  }
   0xd   : > { %186 = vperm.xlu0 %3023, %v3146_v0   ;;  %236 = vperm.xlu1 %3025, %v3146_v0   ;;  %v3065_v9 = vmov 8   ;;  %v3066_v10 = vmov 9   ;;  %v164_v11 = vlaneseq  ;;  %vm201_vm0 = vcmask 1039360   ;;  %s3079_s30 = smov 86   ;;  %s3080_s3 = smov 87  }
   0xe   : > { %s135_s16 = scalar_lea.vmem %s3698_s0, %s2951_s13  ;;  %vm226_vm1 = vcmask 1031168   ;;  %vm251_vm2 = vcmask 900096   ;;  %vm276_vm3 = vcmask 891904   ;;  %vm301_vm4 = vcmask 883712   ;;  %s3081_s4 = smov 103  }
   0xf   : > { %v165_v12 = vshrl.u32 %v164_v11, 7  ;;  %v157_v15 = vld [vmem:[%s135_s16] sm:$0x7]  ;;  %vm326_vm5 = vcmask 752640   ;;  %vm351_vm6 = vcmask 744448   ;;  %vm376_vm7 = vcmask 736256  }
  0x10   : > { %vm143_vm9 = vcmask 949248   ;;  %vm421_vm11 = vcmask 23552   ;;  %vm445_vm14 = vcmask 1047744   ;;  %vm439_vm15 = vcmask 130048   ;;  %s3082_s5 = smov 104   ;;  %s3083_s6 = smov 105  }
  0x11   : > { %3024 = vset.pattern.permute.xlu0 %v3059_v3  ;;  %3026 = vset.pattern.permute.xlu1 %v3060_v4  ;;  %v3169_v13 = vsub.s32 2, %v165_v12  ;;  %v3171_v14 = vsub.s32 0, %v165_v12  ;;  %v3179_v18 = vsub.s32 1, %v165_v12  ;;  %s3084_s7 = smov 121   ;;  %s3085_s8 = smov 122  }
  0x12   : > { %211 = vperm.xlu0 %3024, %v3146_v0   ;;  %261 = vperm.xlu1 %3026, %v3146_v0   ;;  %s3088_s11 = smov 123   ;;  %s3089_s12 = smov 118  }
  0x13   : > { %v3174_v16 = vrot.slane %v157_v15, %v3169_v13  ;;  %v3177_v17 = vrot.slane %v157_v15, %v3171_v14  ;;  %v3184_v22 = vrot.slane %v157_v15, %v3179_v18  ;;  %s3090_s13 = smov 8   ;;  %s3097_s26 = smov 35  }
  0x14   : > { %s3098_s27 = smov 45   ;;  %s3115_s14 = smov 67  }
  0x15   : > { %s3116_s15 = smov 66   ;;  %s3117_s16 = smov 34  }
  0x16   : > { %3027 = vset.pattern.permute.xlu1 %v3061_v5  ;;  %3028 = vset.pattern.permute.xlu0 %v3062_v6 }
  0x17   : > { %286 = vperm.xlu1 %3027, %v3146_v0   ;;  %311 = vperm.xlu0 %3028, %v3146_v0  }
  0x1b   : > { %3029 = vset.pattern.permute.xlu1 %v3063_v7  ;;  %3031 = vset.pattern.permute.xlu0 %v3064_v8 }
  0x1c   : > { %336 = vperm.xlu1 %3029, %v3146_v0   ;;  %160 = vperm.xlu0 %3031, %v3146_v0  }
  0x20   : > { %3030 = vset.pattern.permute.xlu1 %v3065_v9 }
  0x21   : > { %361 = vperm.xlu1 %3030, %v3146_v0  }
  0x25   : > { %3032 = vset.pattern.permute.xlu1 %v3066_v10 }
  0x26   : > { %386 = vperm.xlu1 %3032, %v3146_v0  }
  0x88   : > { %v187_v19 = vpop.permute.xlu0 %186  ;;  %v237_v25 = vpop.permute.xlu1 %236 }
  0x89   : > { %v191_v20 = vmul.f32 %v187_v19, %v3174_v16  ;;  %v189_v21 = vmul.f32 %v187_v19, %v3177_v17  ;;  %v190_v24 = vmul.f32 %v187_v19, %v3184_v22  ;;  %v239_v28 = vmul.f32 %v237_v25, %v3177_v17 }
  0x8a   : > { %v241_v30 = vmul.f32 %v237_v25, %v3174_v16  ;;  %v240_v33 = vmul.f32 %v237_v25, %v3184_v22 }
  0x8b   : > { %199 = vrot.lane.b32.xlu0 %v191_v20, %s3067_s17  ;;  %195 = vrot.lane.b32.xlu1 %v189_v21, %s3067_s17 }
  0x8d   : > { %v212_v23 = vpop.permute.xlu0 %211  ;;  %v262_v29 = vpop.permute.xlu1 %261 }
  0x8e   : > { %v215_v26 = vmul.f32 %v212_v23, %v3184_v22  ;;  %v214_v27 = vmul.f32 %v212_v23, %v3177_v17  ;;  %v216_v31 = vmul.f32 %v212_v23, %v3174_v16  ;;  %v265_v32 = vmul.f32 %v262_v29, %v3184_v22 }
  0x8f   : > { %197 = vrot.lane.b32.xlu1 %v190_v24, %s3067_s17  ;;  %v264_v35 = vmul.f32 %v262_v29, %v3177_v17  ;;  %v266_v38 = vmul.f32 %v262_v29, %v3174_v16  ;;  %s3118_s17 = smov 2  }
  0x90   : > { %222 = vrot.lane.b32.xlu0 %v215_v26, %s3068_s18 }
  0x92   : > { %v287_v34 = vpop.permute.xlu1 %286  ;;  %v312_v39 = vpop.permute.xlu0 %311 }
  0x93   : > { %220 = vrot.lane.b32.xlu1 %v214_v27, %s3068_s18  ;;  %v289_v36 = vmul.f32 %v287_v34, %v3177_v17  ;;  %v291_v37 = vmul.f32 %v287_v34, %v3174_v16  ;;  %v315_v40 = vmul.f32 %v312_v39, %v3184_v22  ;;  %v290_v41 = vmul.f32 %v287_v34, %v3184_v22 }
  0x94   : > { %245 = vrot.lane.b32.xlu0 %v239_v28, %s3069_s19  ;;  %v314_v43 = vmul.f32 %v312_v39, %v3177_v17  ;;  %v316_v46 = vmul.f32 %v312_v39, %v3174_v16 }
  0x97   : > { %224 = vrot.lane.b32.xlu1 %v216_v31, %s3068_s18  ;;  %v337_v42 = vpop.permute.xlu1 %336  ;;  %v161_v53 = vpop.permute.xlu0 %160  ;;  %s3107_s18 = smov 114  }
  0x98   : > { %249 = vrot.lane.b32.xlu0 %v241_v30, %s3069_s19  ;;  %v339_v44 = vmul.f32 %v337_v42, %v3177_v17  ;;  %v341_v45 = vmul.f32 %v337_v42, %v3174_v16  ;;  %v340_v49 = vmul.f32 %v337_v42, %v3184_v22  ;;  %v181_v3 = vmul.f32 %v3174_v16, %v161_v53 }
  0x99   : > { %v179_v12 = vmul.f32 %v3177_v17, %v161_v53  ;;  %v180_v19 = vmul.f32 %v3184_v22, %v161_v53 }
  0x9b   : > { %247 = vrot.lane.b32.xlu1 %v240_v33, %s3069_s19 }
  0x9c   : > { %272 = vrot.lane.b32.xlu0 %v265_v32, %s3070_s20  ;;  %v362_v47 = vpop.permute.xlu1 %361 }
  0x9d   : > { %v364_v48 = vmul.f32 %v362_v47, %v3177_v17  ;;  %v365_v50 = vmul.f32 %v362_v47, %v3184_v22  ;;  %v366_v51 = vmul.f32 %v362_v47, %v3174_v16 }
  0x9f   : > { %270 = vrot.lane.b32.xlu1 %v264_v35, %s3070_s20 }
  0xa0   : > { %295 = vrot.lane.b32.xlu0 %v289_v36, %s3071_s21 }
  0xa1   : > { %v3211_v52 = vpop.permute.xlu1 %386 }
  0xa3   : > { %274 = vrot.lane.b32.xlu1 %v266_v38, %s3070_s20  ;;  %s2747_s20 = sshll.u32 %s3702_s10, 5 }
  0xa4   : > { %299 = vrot.lane.b32.xlu0 %v291_v37, %s3071_s21 }
  0xa7   : > { %297 = vrot.lane.b32.xlu1 %v290_v41, %s3071_s21  ;;  %s3091_s21 = smov 49  }
  0xa8   : > { %322 = vrot.lane.b32.xlu0 %v315_v40, %s3072_s22 }
  0xab   : > { %320 = vrot.lane.b32.xlu1 %v314_v43, %s3072_s22 }
  0xac   : > { %345 = vrot.lane.b32.xlu0 %v339_v44, %s3073_s23 }
  0xaf   : > { %324 = vrot.lane.b32.xlu1 %v316_v46, %s3072_s22  ;;  %s3092_s22 = smov 13  }
  0xb0   : > { %349 = vrot.lane.b32.xlu0 %v341_v45, %s3073_s23 }
  0xb3   : > { %347 = vrot.lane.b32.xlu1 %v340_v49, %s3073_s23  ;;  %s3094_s23 = smov 125  }
  0xb4   : > { %370 = vrot.lane.b32.xlu0 %v364_v48, %s3074_s24 }
  0xb7   : > { %372 = vrot.lane.b32.xlu1 %v365_v50, %s3074_s24 }
  0xb8   : > { %374 = vrot.lane.b32.xlu0 %v366_v51, %s3074_s24  ;;  %s3095_s24 = smov 33  }
  0xfd   : > { %v200_v54 = vpop.permute.xlu0 %199  ;;  %v196_v55 = vpop.permute.xlu1 %195 }
  0xfe   : > { %v209_v6 = vadd.f32 %v200_v54, %v181_v3 }
 0x101   : > { %v198_v56 = vpop.permute.xlu1 %197 }
 0x102   : > { %v223_v57 = vpop.permute.xlu0 %222  ;;  %v202_v10 = vsel %vm201_vm0, %v196_v55, %v198_v56  ;;  %v203_v15 = vsel %vm201_vm0, %v198_v56, %v200_v54  ;;  %vm3086_vm0 = vmmov 0  }
 0x103   : > { %v207_v21 = vadd.f32 %v202_v10, %v179_v12  ;;  %v208_v25 = vadd.f32 %v203_v15, %v180_v19 }
 0x105   : > { %v221_v58 = vpop.permute.xlu1 %220 }
 0x106   : > { %v246_v59 = vpop.permute.xlu0 %245  ;;  %v227_v20 = vsel %vm226_vm1, %v221_v58, %v223_v57 }
 0x107   : > { %v232_v28 = vadd.f32 %v227_v20, %v207_v21 }
 0x109   : > { %v225_v60 = vpop.permute.xlu1 %224 }
 0x10a   : > { %v250_v61 = vpop.permute.xlu0 %249  ;;  %v234_v7 = vadd.f32 %v225_v60, %v209_v6  ;;  %v228_v23 = vsel %vm226_vm1, %v223_v57, %v225_v60  ;;  %vm471_vm1 = vcmask 556032  }
 0x10b   : > { %v233_v17 = vadd.f32 %v228_v23, %v208_v25 }
 0x10c   : > { %v259_v24 = vadd.f32 %v250_v61, %v234_v7  ;;  %v2717_v7 = vld [vmem:[%s3699_s1 + $0x18] ss:$8 sm:$0x7] }
 0x10d   : > { %v248_v62 = vpop.permute.xlu1 %247  ;;  %vm395_vm8 = vcmp.gt.f32.partialorder %v2717_v7, 0.5 }
 0x10e   : > { %v273_v63 = vpop.permute.xlu0 %272  ;;  %v252_v26 = vsel %vm251_vm2, %v246_v59, %v248_v62  ;;  %v253_v29 = vsel %vm251_vm2, %v248_v62, %v250_v61  ;;  %v3075_v62 = vmov 0.0  }
 0x10f   : > { %v257_v32 = vadd.f32 %v252_v26, %v232_v28  ;;  %v258_v34 = vadd.f32 %v253_v29, %v233_v17  ;;  %141 = vst [vmem:[#allocation2] sm:$0xff] %v3075_v62  ;;  %145 = vst [vmem:[#allocation2 + $0x18] sm:$0xff] %v3075_v62  ;;  %2815 = vmatprep.subr.mxu1 %v3075_v62  ;;  %742 = vmatprep.mubr.f32.mxu0 %v3075_v62 }
 0x110   : > { %146 = vst [vmem:[#allocation2 + $0x20] sm:$0xff] %v3075_v62  ;;  %148 = vst [vmem:[#allocation3] sm:$0xff] %v3075_v62  ;;  %2833 = vmatprep.mubr.msk.f32.mxu1 %vm3086_vm0, %v3075_v62 }
 0x111   : > { %v271_v1 = vpop.permute.xlu1 %270  ;;  %151 = vst [vmem:[#allocation3 + $0x18] sm:$0xff] %v3075_v62  ;;  %144 = vst.msk [vmem:[#allocation2 + $0x10] sm:$0xff] %vm143_vm9, %v3075_v62 }
 0x112   : > { %v296_v2 = vpop.permute.xlu0 %295  ;;  %v277_v31 = vsel %vm276_vm3, %v271_v1, %v273_v63  ;;  %150 = vst.msk [vmem:[#allocation3 + $0x10] sm:$0xff] %vm143_vm9, %v3075_v62  ;;  %vm527_vm9 = vcmask 859136  }
 0x113   : > { %v282_v37 = vadd.f32 %v277_v31, %v257_v32  ;;  %v3087_v31 = vmov 82  }
 0x114   : > { %3033 = vset.pattern.permute.xlu1 %v3087_v31 }
 0x115   : > { %v275_v4 = vpop.permute.xlu1 %274 }
 0x116   : > { %v300_v5 = vpop.permute.xlu0 %299  ;;  %v284_v30 = vadd.f32 %v275_v4, %v259_v24  ;;  %v278_v33 = vsel %vm276_vm3, %v273_v63, %v275_v4  ;;  %vm632_vm3 = vcmask 695296  }
 0x117   : > { %v283_v40 = vadd.f32 %v278_v33, %v258_v34 }
 0x118   : > { %v309_v38 = vadd.f32 %v300_v5, %v284_v30 }
 0x119   : > { %v298_v9 = vpop.permute.xlu1 %297 }
 0x11a   : > { %v323_v11 = vpop.permute.xlu0 %322  ;;  %v302_v35 = vsel %vm301_vm4, %v296_v2, %v298_v9  ;;  %v303_v39 = vsel %vm301_vm4, %v298_v9, %v300_v5  ;;  %v396_v9 = vsel %vm395_vm8, 1, %v3064_v8  ;;  %vm611_vm4 = vcmask 703488  }
 0x11b   : > { %v307_v42 = vadd.f32 %v302_v35, %v282_v37  ;;  %v308_v46 = vadd.f32 %v303_v39, %v283_v40  ;;  %v404_v10 = vrot.slane %v396_v9, %v3179_v18  ;;  %vm548_vm8 = vcmask 850944  }
 0x11d   : > { %v321_v16 = vpop.permute.xlu1 %320  ;;  %vm410_vm12 = vcmp.eq.s32.totalorder %v404_v10, 1 }
 0x11e   : > { %v346_v27 = vpop.permute.xlu0 %345  ;;  %v327_v41 = vsel %vm326_vm5, %v321_v16, %v323_v11 }
 0x11f   : > { %v332_v49 = vadd.f32 %v327_v41, %v307_v42 }
 0x121   : > { %v325_v22 = vpop.permute.xlu1 %324 }
 0x122   : > { %v350_v36 = vpop.permute.xlu0 %349  ;;  %v328_v43 = vsel %vm326_vm5, %v323_v11, %v325_v22  ;;  %v334_v44 = vadd.f32 %v325_v22, %v309_v38  ;;  %v408_v11 = vrot.slane %v396_v9, %v3169_v13 }
 0x123   : > { %v333_v51 = vadd.f32 %v328_v43, %v308_v46 }
 0x124   : > { %v359_v53 = vadd.f32 %v350_v36, %v334_v44  ;;  %vm411_vm13 = vcmp.eq.s32.totalorder %v408_v11, 1 }
 0x125   : > { %v348_v45 = vpop.permute.xlu1 %347 }
 0x126   : > { %v352_v47 = vsel %vm351_vm6, %v346_v27, %v348_v45  ;;  %v371_v48 = vpop.permute.xlu0 %370  ;;  %v353_v50 = vsel %vm351_vm6, %v348_v45, %v350_v36  ;;  %vm590_vm6 = vcmask 711680  }
 0x127   : > { %v357_v54 = vadd.f32 %v352_v47, %v332_v49  ;;  %v358_v56 = vadd.f32 %v353_v50, %v333_v51 }
 0x129   : > { %v373_v55 = vpop.permute.xlu1 %372 }
 0x12a   : > { %v377_v57 = vsel %vm376_vm7, %v371_v48, %v373_v55  ;;  %v375_v58 = vpop.permute.xlu0 %374 }
 0x12b   : > { %v382_v59 = vadd.f32 %v377_v57, %v357_v54  ;;  %v378_v60 = vsel %vm376_vm7, %v373_v55, %v375_v58  ;;  %v384_v61 = vadd.f32 %v375_v58, %v359_v53  ;;  %vm569_vm7 = vcmask 842752  }
 0x12c   : > { %v383_v63 = vadd.f32 %v378_v60, %v358_v56 }
 0x12d   : > { %v389_v1 = vadd.f32 %v3211_v52, %v382_v59  ;;  %v391_v4 = vadd.f32 %v3211_v52, %v384_v61 }
 0x12e   : > { %v390_v2 = vadd.f32 %v3211_v52, %v383_v63  ;;  %v400_v52 = vrot.slane %v396_v9, %v3171_v14 }
 0x12f   : > { %v392_v3 = vmax.f32 %v389_v1, 0.0  ;;  %v394_v6 = vmax.f32 %v391_v4, 0.0 }
 0x130   : > { %v393_v5 = vmax.f32 %v390_v2, 0.0  ;;  %vm409_vm10 = vcmp.eq.s32.totalorder %v400_v52, 1 }
 0x131   : > { %415 = vrot.lane.b32.xlu1 %v392_v3, %s3076_s25 }
 0x132   : > { %417 = vrot.lane.b32.xlu0 %v393_v5, %s3076_s25 }
 0x135   : > { %419 = vrot.lane.b32.xlu1 %v394_v6, %s3076_s25  ;;  %s3096_s25 = smov 89  }
 0x1a3   : > { %v416_v12 = vpop.permute.xlu1 %415 }
 0x1a4   : > { %v418_v15 = vpop.permute.xlu0 %417  ;;  %v427_v19 = vsel %vm409_vm10, %v416_v12, 0.0  ;;  %vm506_vm10 = vcmask 990208  }
 0x1a5   : > { %433 = vrot.lane.b32.xlu0 %v427_v19, %s3077_s28  ;;  %v422_v20 = vsel %vm421_vm11, %v416_v12, %v418_v15 }
 0x1a6   : > { %v428_v21 = vsel %vm410_vm12, %v422_v20, 0.0  ;;  %vm463_vm12 = vcmask 1006592  }
 0x1a7   : > { %435 = vrot.lane.b32.xlu1 %v428_v21, %s3077_s28  ;;  %v420_v23 = vpop.permute.xlu1 %419 }
 0x1a8   : > { %v423_v24 = vsel %vm421_vm11, %v418_v15, %v420_v23  ;;  %vm485_vm11 = vcmask 998400  }
 0x1a9   : > { %v429_v16 = vsel %vm411_vm13, %v423_v24, 0.0  ;;  %vm675_vm13 = vcmask 588800  }
 0x1aa   : > { %437 = vrot.lane.b32.xlu0 %v429_v16, %s3077_s28 }
 0x217   : > { %v434_v25 = vpop.permute.xlu0 %433 }
 0x218   : > { %446 = vst.msk [vmem:[#allocation2] sm:$0xff] %vm445_vm14, %v434_v25 }
 0x219   : > { %v436_v26 = vpop.permute.xlu1 %435 }
 0x21a   : > { %v3244_v27 = vsel %vm439_vm15, %v434_v25, %v436_v26 }
 0x21c   : > { %v438_v28 = vpop.permute.xlu0 %437 }
 0x21d   : > { %v441_v29 = vsel %vm439_vm15, %v436_v26, %v438_v28 }
 0x21e   : > { %448 = vst.msk [vmem:[#allocation2 + $0x10] sm:$0xff] %vm326_vm5, %v441_v29 }
 0x21f   : > { %v620_v30 = vld [vmem:[#allocation2] sm:$0xff] }
 0x220   : > { %626 = vrot.lane.b32.xlu1 %v620_v30, %s3078_s29  ;;  %605 = vrot.lane.b32.xlu0 %v620_v30, %s3079_s30 }
 0x224   : > { %584 = vrot.lane.b32.xlu1 %v620_v30, %s3080_s3  ;;  %563 = vrot.lane.b32.xlu0 %v620_v30, %s3081_s4 }
 0x225   : > { %v622_v17 = vld [vmem:[#allocation2 + $0x10] sm:$0xff] }
 0x228   : > { %542 = vrot.lane.b32.xlu1 %v620_v30, %s3082_s5  ;;  %521 = vrot.lane.b32.xlu0 %v620_v30, %s3083_s6 }
 0x22c   : > { %500 = vrot.lane.b32.xlu1 %v620_v30, %s3084_s7  ;;  %479 = vrot.lane.b32.xlu0 %v620_v30, %s3085_s8 }
 0x230   : > { %630 = vrot.lane.b32.xlu0 %v622_v17, %s3078_s29  ;;  %628 = vrot.lane.b32.xlu1 %v3244_v27, %s3078_s29 }
 0x234   : > { %609 = vrot.lane.b32.xlu1 %v622_v17, %s3079_s30  ;;  %607 = vrot.lane.b32.xlu0 %v3244_v27, %s3079_s30  ;;  %s3100_s30 = smov 65  }
 0x238   : > { %588 = vrot.lane.b32.xlu0 %v622_v17, %s3080_s3  ;;  %586 = vrot.lane.b32.xlu1 %v3244_v27, %s3080_s3  ;;  %s3101_s3 = smov 75  }
 0x23c   : > { %567 = vrot.lane.b32.xlu1 %v622_v17, %s3081_s4  ;;  %565 = vrot.lane.b32.xlu0 %v3244_v27, %s3081_s4 }
 0x240   : > { %546 = vrot.lane.b32.xlu0 %v622_v17, %s3082_s5  ;;  %544 = vrot.lane.b32.xlu1 %v3244_v27, %s3082_s5 }
 0x244   : > { %525 = vrot.lane.b32.xlu1 %v622_v17, %s3083_s6  ;;  %523 = vrot.lane.b32.xlu0 %v3244_v27, %s3083_s6 }
 0x248   : > { %504 = vrot.lane.b32.xlu0 %v622_v17, %s3084_s7  ;;  %502 = vrot.lane.b32.xlu1 %v3244_v27, %s3084_s7  ;;  %s3102_s7 = smov 95  }
 0x24c   : > { %483 = vrot.lane.b32.xlu1 %v622_v17, %s3085_s8  ;;  %481 = vrot.lane.b32.xlu0 %v3244_v27, %s3085_s8  ;;  %s3103_s8 = smov 93  }
 0x250   : > { %461 = vrot.lane.b32.xlu0 %v622_v17, %s3088_s11  ;;  %459 = vrot.lane.b32.xlu1 %v3244_v27, %s3088_s11 }
 0x254   : > { %457 = vrot.lane.b32.xlu1 %v620_v30, %s3088_s11  ;;  %673 = vrot.lane.b32.xlu0 %v3146_v0, %s3089_s12  ;;  %s3104_s11 = smov 94  }
 0x258   : > { %670 = vperm.xlu1 %3033, %v3146_v0  }
 0x292   : > { %v606_v32 = vpop.permute.xlu0 %605  ;;  %v627_v33 = vpop.permute.xlu1 %626 }
 0x296   : > { %v564_v22 = vpop.permute.xlu0 %563  ;;  %v585_v34 = vpop.permute.xlu1 %584 }
 0x29a   : > { %v3274_v35 = vpop.permute.xlu0 %521  ;;  %v543_v36 = vpop.permute.xlu1 %542 }
 0x29e   : > { %v3276_v37 = vpop.permute.xlu0 %479  ;;  %v3278_v38 = vpop.permute.xlu1 %500 }
 0x2a2   : > { %v631_v39 = vpop.permute.xlu0 %630  ;;  %v629_v40 = vpop.permute.xlu1 %628 }
 0x2a3   : > { %640 = vst.msk [vmem:[#allocation4 + $0xd0] sm:$0xff] %vm471_vm1, %v631_v39  ;;  %v633_v41 = vsel %vm632_vm3, %v627_v33, %v629_v40  ;;  %v634_v42 = vsel %vm632_vm3, %v629_v40, %v631_v39  ;;  %v2718_v39 = vld [vmem:[%s3699_s1 + $0x18] ss:$8 sm:$0x7] }
 0x2a4   : > { %638 = vst [vmem:[#allocation4 + $0xc0] sm:$0xff] %v633_v41  ;;  %692 = vmatprep.subr.mxu0 %v634_v42 }
 0x2a5   : > { %693 = vmatpush1.msra.mxu0 %v633_v41 }
 0x2a6   : > { %v608_v0 = vpop.permute.xlu0 %607  ;;  %v610_v43 = vpop.permute.xlu1 %609 }
 0x2a7   : > { %v612_v44 = vsel %vm611_vm4, %v606_v32, %v608_v0  ;;  %v613_v45 = vsel %vm611_vm4, %v608_v0, %v610_v43  ;;  %619 = vst.msk [vmem:[#allocation4 + $0xb8] sm:$0xff] %vm471_vm1, %v610_v43  ;;  %vm848_vm4 = vcmask 64512  }
 0x2a8   : > { %617 = vst [vmem:[#allocation4 + $0xa8] sm:$0xff] %v612_v44  ;;  %694 = vmatprep.subr.mxu0 %v613_v45 }
 0x2a9   : > { %695 = vmatpush1.msra.mxu0 %v612_v44 }
 0x2aa   : > { %v589_v46 = vpop.permute.xlu0 %588  ;;  %v587_v47 = vpop.permute.xlu1 %586  ;;  %v667_v48 = vld [vmem:[#allocation4 + $0xd0] sm:$0xff] }
 0x2ab   : > { %598 = vst.msk [vmem:[#allocation4 + $0xa0] sm:$0xff] %vm471_vm1, %v589_v46  ;;  %v591_v49 = vsel %vm590_vm6, %v585_v34, %v587_v47  ;;  %v592_v50 = vsel %vm590_vm6, %v587_v47, %v589_v46  ;;  %2816 = vmatpush3.msra.mxu1 %v667_v48 }
 0x2ac   : > { %596 = vst [vmem:[#allocation4 + $0x90] sm:$0xff] %v591_v49  ;;  %2817 = vmatprep.subr.mxu1 %v3075_v62  ;;  %696 = vmatprep.subr.mxu0 %v592_v50 }
 0x2ad   : > { %697 = vmatpush1.msra.mxu0 %v591_v49 }
 0x2ae   : > { %v566_v51 = vpop.permute.xlu0 %565  ;;  %v568_v53 = vpop.permute.xlu1 %567  ;;  %v664_v54 = vld [vmem:[#allocation4 + $0xb8] sm:$0xff] }
 0x2af   : > { %v570_v55 = vsel %vm569_vm7, %v564_v22, %v566_v51  ;;  %v571_v56 = vsel %vm569_vm7, %v566_v51, %v568_v53  ;;  %577 = vst.msk [vmem:[#allocation4 + $0x88] sm:$0xff] %vm471_vm1, %v568_v53  ;;  %2818 = vmatpush3.msra.mxu1 %v664_v54  ;;  %v3335_v54 = vld [vmem:[%s3699_s1 + $0x50] sm:$0xff] }
 0x2b0   : > { %575 = vst [vmem:[#allocation4 + $0x78] sm:$0xff] %v570_v55  ;;  %2819 = vmatprep.subr.mxu1 %v3075_v62  ;;  %698 = vmatprep.subr.mxu0 %v571_v56 }
 0x2b1   : > { %699 = vmatpush1.msra.mxu0 %v570_v55  ;;  %v3342_v55 = vld [vmem:[%s3699_s1 + $0x18] sm:$0xff] }
 0x2b2   : > { %v547_v57 = vpop.permute.xlu0 %546  ;;  %v545_v58 = vpop.permute.xlu1 %544  ;;  %v661_v59 = vld [vmem:[#allocation4 + $0xa0] sm:$0xff] }
 0x2b3   : > { %556 = vst.msk [vmem:[#allocation4 + $0x70] sm:$0xff] %vm471_vm1, %v547_v57  ;;  %v549_v60 = vsel %vm548_vm8, %v543_v36, %v545_v58  ;;  %v550_v61 = vsel %vm548_vm8, %v545_v58, %v547_v57  ;;  %2820 = vmatpush3.msra.mxu1 %v661_v59  ;;  %vm1145_vm8 = vcmask 515512  }
 0x2b4   : > { %554 = vst [vmem:[#allocation4 + $0x60] sm:$0xff] %v549_v60  ;;  %2821 = vmatprep.subr.mxu1 %v3075_v62  ;;  %700 = vmatprep.subr.mxu0 %v550_v61 }
 0x2b5   : > { %701 = vmatpush1.msra.mxu0 %v549_v60 }
 0x2b6   : > { %v524_v63 = vpop.permute.xlu0 %523  ;;  %v526_v1 = vpop.permute.xlu1 %525  ;;  %v658_v2 = vld [vmem:[#allocation4 + $0x88] sm:$0xff] }
 0x2b7   : > { %v528_v3 = vsel %vm527_vm9, %v3274_v35, %v524_v63  ;;  %v529_v4 = vsel %vm527_vm9, %v524_v63, %v526_v1  ;;  %535 = vst.msk [vmem:[#allocation4 + $0x58] sm:$0xff] %vm471_vm1, %v526_v1  ;;  %2822 = vmatpush3.msra.mxu1 %v658_v2  ;;  %vm1232_vm9 = vcmask 597512  }
 0x2b8   : > { %533 = vst [vmem:[#allocation4 + $0x48] sm:$0xff] %v528_v3  ;;  %2823 = vmatprep.subr.mxu1 %v3075_v62  ;;  %702 = vmatprep.subr.mxu0 %v529_v4 }
 0x2b9   : > { %703 = vmatpush1.msra.mxu0 %v528_v3 }
 0x2ba   : > { %v505_v5 = vpop.permute.xlu0 %504  ;;  %v503_v6 = vpop.permute.xlu1 %502  ;;  %v655_v7 = vld [vmem:[#allocation4 + $0x70] sm:$0xff] }
 0x2bb   : > { %514 = vst.msk [vmem:[#allocation4 + $0x40] sm:$0xff] %vm471_vm1, %v505_v5  ;;  %v507_v9 = vsel %vm506_vm10, %v3278_v38, %v503_v6  ;;  %v508_v52 = vsel %vm506_vm10, %v503_v6, %v505_v5  ;;  %2824 = vmatpush3.msra.mxu1 %v655_v7  ;;  %vm1319_vm10 = vcmask 679512  }
 0x2bc   : > { %512 = vst [vmem:[#allocation4 + $0x30] sm:$0xff] %v507_v9  ;;  %2825 = vmatprep.subr.mxu1 %v3075_v62  ;;  %704 = vmatprep.subr.mxu0 %v508_v52 }
 0x2bd   : > { %705 = vmatpush1.msra.mxu0 %v507_v9 }
 0x2be   : > { %v482_v10 = vpop.permute.xlu0 %481  ;;  %v484_v11 = vpop.permute.xlu1 %483  ;;  %v652_v12 = vld [vmem:[#allocation4 + $0x58] sm:$0xff] }
 0x2bf   : > { %v486_v15 = vsel %vm485_vm11, %v3276_v37, %v482_v10  ;;  %v487_v19 = vsel %vm485_vm11, %v482_v10, %v484_v11  ;;  %493 = vst.msk [vmem:[#allocation4 + $0x28] sm:$0xff] %vm471_vm1, %v484_v11  ;;  %2826 = vmatpush3.msra.mxu1 %v652_v12  ;;  %vm1411_vm11 = vcmask 761512  }
 0x2c0   : > { %491 = vst [vmem:[#allocation4 + $0x18] sm:$0xff] %v486_v15  ;;  %2827 = vmatprep.subr.mxu1 %v3075_v62  ;;  %706 = vmatprep.subr.mxu0 %v487_v19 }
 0x2c1   : > { %707 = vmatpush1.msra.mxu0 %v486_v15 }
 0x2c2   : > { %v462_v20 = vpop.permute.xlu0 %461  ;;  %v460_v21 = vpop.permute.xlu1 %459  ;;  %v649_v23 = vld [vmem:[#allocation4 + $0x40] sm:$0xff] }
 0x2c3   : > { %472 = vst.msk [vmem:[#allocation4 + $0x10] sm:$0xff] %vm471_vm1, %v462_v20  ;;  %v465_v24 = vsel %vm463_vm12, %v460_v21, %v462_v20  ;;  %2828 = vmatpush3.msra.mxu1 %v649_v23  ;;  %vm822_vm1 = vcmp.gt.f32.partialorder %v2718_v39, 0.5 }
 0x2c4   : > { %2829 = vmatprep.subr.mxu1 %v3075_v62  ;;  %708 = vmatprep.subr.mxu0 %v465_v24  ;;  %v823_v40 = vsel %vm822_vm1, 1, %v3064_v8  ;;  %vm1585_vm1 = vcmask 925512  }
 0x2c5   : > { %v827_v41 = vrot.slane %v823_v40, %v3171_v14  ;;  %v831_v42 = vrot.slane %v823_v40, %v3179_v18  ;;  %v835_v0 = vrot.slane %v823_v40, %v3169_v13 }
 0x2c6   : > { %v458_v16 = vpop.permute.xlu1 %457  ;;  %v646_v25 = vld [vmem:[#allocation4 + $0x28] sm:$0xff]  ;;  %v674_v26 = vpop.permute.xlu0 %673 }
 0x2c7   : > { %v464_v28 = vsel %vm463_vm12, %v458_v16, %v460_v21  ;;  %2830 = vmatpush3.msra.mxu1 %v646_v25  ;;  %vm836_vm3 = vcmp.eq.s32.totalorder %v827_v41, 1  ;;  %vm837_vm6 = vcmp.eq.s32.totalorder %v831_v42, 1  ;;  %vm838_vm7 = vcmp.eq.s32.totalorder %v835_v0, 1 }
 0x2c8   : > { %469 = vst [vmem:[#allocation4] sm:$0xff] %v464_v28  ;;  %2831 = vmatprep.subr.mxu1 %v3075_v62  ;;  %709 = vmatpush1.msra.mxu0 %v464_v28  ;;  %vm1498_vm12 = vcmask 843512  }
 0x2c9   : > { %2719 = vmatmul.mubr.msk.f32.vlgmr.msra.gmra.mxu0 %vm675_vm13, %v674_v26  ;;  %2836 = vmatprep.subr.mxu0 %v3075_v62 }
 0x2ca   : > { %v643_v29 = vld [vmem:[#allocation4 + $0x10] sm:$0xff]  ;;  %2840 = vmatprep.mubr.msk.f32.mxu0 %vm3086_vm0, %v3075_v62  ;;  %2837 = vmatpush3.msra.mxu0 %v3335_v54 }
 0x2cb   : > { %2832 = vmatpush3.msra.mxu1 %v643_v29  ;;  %2838 = vmatprep.subr.mxu0 %v3075_v62 }
 0x2cc   : > { %2834 = vmatmul.mubr.msk.f32.vlgmr.msra.gmra.mxu1 %vm675_vm13, %v674_v26  ;;  %2843 = vmatprep.subr.mxu1 %v3075_v62 }
 0x2cd   : > { %2847 = vmatprep.mubr.msk.f32.mxu1 %vm3086_vm0, %v3075_v62  ;;  %2844 = vmatpush3.msra.mxu1 %v3335_v54 }
 0x2ce   : > { %2845 = vmatprep.subr.mxu1 %v3075_v62  ;;  %2839 = vmatpush3.msra.mxu0 %v3342_v55 }
 0x2cf   : > { %2846 = vmatpush3.msra.mxu1 %v3342_v55  ;;  %2850 = vmatprep.subr.mxu0 %v3075_v62 }
 0x2d0   : > { %2857 = vmatprep.subr.mxu1 %v3075_v62 }
 0x2d3   : > { %v671_v30 = vpop.permute.xlu1 %670 }
 0x389   : > { %v744_v17 = vpop.f32.mrf.mxu0 }
 0x38a   : > { %v745_v31 = vadd.f32 %v744_v17, %v671_v30 }
 0x38b   : > { %v746_v32 = vpop.f32.mrf.mxu0 }
 0x38c   : > { %v815_v33 = vpop.f32.mrf.mxu1  ;;  %v747_v22 = vadd.f32 %v746_v32, %v671_v30  ;;  %v819_v34 = vmax.f32 %v745_v31, 0.0 }
 0x38d   : > { %v816_v35 = vadd.f32 %v815_v33, %v671_v30 }
 0x38e   : > { %v2835_v36 = vpop.f32.mrf.mxu1  ;;  %v820_v37 = vmax.f32 %v747_v22, 0.0  ;;  %842 = vrot.lane.b32.xlu0 %v819_v34, %s3090_s13 }
 0x38f   : > { %v821_v38 = vmax.f32 %v816_v35, 0.0 }
 0x390   : > { %844 = vrot.lane.b32.xlu1 %v820_v37, %s3090_s13 }
 0x392   : > { %846 = vrot.lane.b32.xlu0 %v821_v38, %s3090_s13  ;;  %s3106_s13 = smov 115  }
 0x400   : > { %v843_v43 = vpop.permute.xlu0 %842 }
 0x401   : > { %v854_v44 = vsel %vm836_vm3, %v843_v43, 0.0  ;;  %vm1598_vm3 = vcmask 818176  }
 0x402   : > { %v845_v45 = vpop.permute.xlu1 %844  ;;  %860 = vrot.lane.b32.xlu1 %v854_v44, %s3077_s28 }
 0x403   : > { %v849_v46 = vsel %vm848_vm4, %v843_v43, %v845_v45 }
 0x404   : > { %v847_v47 = vpop.permute.xlu0 %846  ;;  %v855_v48 = vsel %vm837_vm6, %v849_v46, 0.0  ;;  %vm1662_vm6 = vcmask 760832  }
 0x405   : > { %v850_v8 = vsel %vm848_vm4, %v845_v45, %v847_v47  ;;  %862 = vrot.lane.b32.xlu0 %v855_v48, %s3077_s28 }
 0x406   : > { %v856_v14 = vsel %vm838_vm7, %v850_v8, 0.0  ;;  %vm1650_vm7 = vcmask 769024  }
 0x407   : > { %864 = vrot.lane.b32.xlu1 %v856_v14, %s3077_s28  ;;  %s3099_s28 = smov 55   ;;  %v3431_v14 = vld [vmem:[%s3699_s1 + $0x8] sm:$0xff] }
 0x474   : > { %v861_v13 = vpop.permute.xlu1 %860 }
 0x475   : > { %871 = vst.msk [vmem:[#allocation3] sm:$0xff] %vm445_vm14, %v861_v13  ;;  %vm964_vm14 = vcmask 351512  }
 0x477   : > { %v863_v18 = vpop.permute.xlu0 %862 }
 0x478   : > { %v3322_v49 = vsel %vm439_vm15, %v861_v13, %v863_v18  ;;  %v3439_v13 = vld [vmem:[%s3699_s1 + $0x40] sm:$0xff] }
 0x479   : > { %v865_v50 = vpop.permute.xlu1 %864 }
 0x47a   : > { %v867_v51 = vsel %vm439_vm15, %v863_v18, %v865_v50  ;;  %v3108_v18 = vmov 27   ;;  %v1587_v50 = vld [vmem:[%s3699_s1] sm:$0xff] }
 0x47b   : > { %873 = vst.msk [vmem:[#allocation3 + $0x10] sm:$0xff] %vm326_vm5, %v867_v51  ;;  %vm876_vm5 = vcmask 1014976   ;;  %3035 = vset.pattern.permute.xlu1 %v3108_v18  ;;  %3034 = vset.pattern.permute.xlu0 %v3108_v18  ;;  %v1589_v51 = vld [vmem:[%s3699_s1 + $0x38] sm:$0xff] }
 0x47c   : > { %v879_v53 = vld [vmem:[#allocation3] sm:$0xff]  ;;  %877 = vst.msk [vmem:[#allocation2] sm:$0xff] %vm876_vm5, %v3075_v62  ;;  %878 = vst.msk [vmem:[#allocation2 + $0x18] sm:$0xff] %vm876_vm5, %v3075_v62 }
 0x47d   : > { %881 = vrot.lane.b32.xlu0 %v879_v53, %s3069_s19  ;;  %968 = vrot.lane.b32.xlu1 %v879_v53, %s3069_s19 }
 0x481   : > { %1149 = vrot.lane.b32.xlu1 %v3322_v49, %s3069_s19  ;;  %1056 = vrot.lane.b32.xlu0 %v3322_v49, %s3069_s19 }
 0x482   : > { %v1413_v56 = vld [vmem:[#allocation3 + $0x10] sm:$0xff] }
 0x485   : > { %1325 = vrot.lane.b32.xlu1 %v3322_v49, %s3069_s19  ;;  %1236 = vrot.lane.b32.xlu0 %v3322_v49, %s3069_s19 }
 0x489   : > { %1415 = vrot.lane.b32.xlu1 %v1413_v56, %s3069_s19  ;;  %1327 = vrot.lane.b32.xlu0 %v1413_v56, %s3069_s19 }
 0x48d   : > { %1502 = vrot.lane.b32.xlu0 %v1413_v56, %s3069_s19  ;;  %s3093_s19 = smov 69  }
 0x4ef   : > { %v969_v57 = vpop.permute.xlu1 %968  ;;  %v882_v58 = vpop.permute.xlu0 %881 }
 0x4f0   : > { %v971_v59 = vadd.f32 %v969_v57, %v879_v53  ;;  %v884_v60 = vadd.f32 %v882_v58, %v879_v53 }
 0x4f2   : > { %973 = vrot.lane.b32.xlu0 %v971_v59, %s3091_s21  ;;  %886 = vrot.lane.b32.xlu1 %v884_v60, %s3078_s29 }
 0x4f3   : > { %v1150_v61 = vpop.permute.xlu1 %1149  ;;  %v1057_v63 = vpop.permute.xlu0 %1056 }
 0x4f4   : > { %v1059_v1 = vadd.f32 %v1057_v63, %v879_v53  ;;  %v1060_v2 = vadd.f32 %v1057_v63, %v3322_v49  ;;  %v1152_v5 = vadd.f32 %v1150_v61, %v3322_v49 }
 0x4f6   : > { %1065 = vrot.lane.b32.xlu0 %v1060_v2, %s3092_s22  ;;  %1063 = vrot.lane.b32.xlu1 %v1059_v1, %s3092_s22 }
 0x4f7   : > { %v1326_v3 = vpop.permute.xlu1 %1325  ;;  %v1237_v4 = vpop.permute.xlu0 %1236 }
 0x4f8   : > { %v1239_v6 = vadd.f32 %v1237_v4, %v3322_v49 }
 0x4fa   : > { %1154 = vrot.lane.b32.xlu1 %v1152_v5, %s3083_s6  ;;  %1241 = vrot.lane.b32.xlu0 %v1239_v6, %s3093_s19  ;;  %s140_s19 = scalar_lea.vmem %s3700_s2, %s2747_s20 }
 0x4fb   : > { %v1416_v7 = vpop.permute.xlu1 %1415  ;;  %v1328_v9 = vpop.permute.xlu0 %1327 }
 0x4fc   : > { %v1418_v52 = vadd.f32 %v1416_v7, %v1413_v56  ;;  %v1329_v10 = vsel %vm251_vm2, %v1326_v3, %v1328_v9  ;;  %vm1067_vm2 = vcmask 105472  }
 0x4fd   : > { %v1331_v11 = vadd.f32 %v1329_v10, %v3322_v49 }
 0x4fe   : > { %1420 = vrot.lane.b32.xlu0 %v1418_v52, %s3094_s23  ;;  %s3109_s23 = smov 76  }
 0x4ff   : > { %1333 = vrot.lane.b32.xlu1 %v1331_v11, %s3095_s24  ;;  %v1503_v12 = vpop.permute.xlu0 %1502 }
 0x500   : > { %v1505_v15 = vadd.f32 %v1503_v12, %v1413_v56 }
 0x503   : > { %1507 = vrot.lane.b32.xlu1 %v1505_v15, %s3096_s25 }
 0x564   : > { %v887_v19 = vpop.permute.xlu1 %886  ;;  %v974_v20 = vpop.permute.xlu0 %973 }
 0x565   : > { %2841 = vmatmul.mubr.msk.f32.vlgmr.msra.gmra.mxu0 %vm439_vm15, %v887_v19  ;;  %2848 = vmatmul.mubr.msk.f32.vlgmr.msra.gmra.mxu1 %vm439_vm15, %v974_v20 }
 0x566   : > { %2851 = vmatpush3.msra.mxu0 %v3335_v54  ;;  %2854 = vmatprep.mubr.msk.f32.mxu0 %vm3086_vm0, %v3075_v62 }
 0x567   : > { %2852 = vmatprep.subr.mxu0 %v3075_v62  ;;  %2858 = vmatpush3.msra.mxu1 %v3335_v54 }
 0x568   : > { %v1064_v21 = vpop.permute.xlu1 %1063  ;;  %v1066_v23 = vpop.permute.xlu0 %1065  ;;  %2853 = vmatpush3.msra.mxu0 %v3342_v55  ;;  %2859 = vmatprep.subr.mxu1 %v3075_v62 }
 0x569   : > { %v1068_v24 = vsel %vm1067_vm2, %v1064_v21, %v1066_v23  ;;  %2864 = vmatprep.subr.mxu0 %v3075_v62  ;;  %2860 = vmatpush3.msra.mxu1 %v3342_v55  ;;  %vm1638_vm2 = vcmask 777216  }
 0x56a   : > { %2855 = vmatmul.mubr.msk.f32.vlgmr.msra.gmra.mxu0 %vm439_vm15, %v1068_v24  ;;  %2861 = vmatprep.mubr.msk.f32.mxu1 %vm3086_vm0, %v3075_v62 }
 0x56b   : > { %2865 = vmatpush3.msra.mxu0 %v3335_v54  ;;  %2868 = vmatprep.mubr.msk.f32.mxu0 %vm3086_vm0, %v3075_v62 }
 0x56c   : > { %v1155_v16 = vpop.permute.xlu1 %1154  ;;  %2866 = vmatprep.subr.mxu0 %v3075_v62  ;;  %v1242_v25 = vpop.permute.xlu0 %1241  ;;  %2871 = vmatprep.subr.mxu1 %v3075_v62 }
 0x56d   : > { %2862 = vmatmul.mubr.msk.f32.vlgmr.msra.gmra.mxu1 %vm439_vm15, %v1155_v16  ;;  %2867 = vmatpush3.msra.mxu0 %v3342_v55 }
 0x56e   : > { %2869 = vmatmul.mubr.msk.f32.vlgmr.msra.gmra.mxu0 %vm439_vm15, %v1242_v25  ;;  %2878 = vmatprep.subr.mxu0 %v3075_v62 }
 0x56f   : > { %2872 = vmatpush3.msra.mxu1 %v3335_v54  ;;  %2879 = vmatpush3.msra.mxu0 %v3335_v54 }
 0x570   : > { %2873 = vmatprep.subr.mxu1 %v3075_v62  ;;  %2880 = vmatprep.subr.mxu0 %v3075_v62  ;;  %v1421_v26 = vpop.permute.xlu0 %1420 }
 0x571   : > { %v1334_v28 = vpop.permute.xlu1 %1333  ;;  %2874 = vmatpush3.msra.mxu1 %v3342_v55  ;;  %2875 = vmatprep.mubr.msk.f32.mxu1 %vm3086_vm0, %v3075_v62 }
 0x572   : > { %2881 = vmatpush3.msra.mxu0 %v3342_v55  ;;  %2882 = vmatprep.mubr.msk.f32.mxu0 %vm3086_vm0, %v3075_v62 }
 0x573   : > { %2876 = vmatmul.mubr.msk.f32.vlgmr.msra.gmra.mxu1 %vm439_vm15, %v1334_v28  ;;  %2883 = vmatmul.mubr.msk.f32.vlgmr.msra.gmra.mxu0 %vm439_vm15, %v1421_v26 }
 0x574   : > { %2885 = vmatprep.subr.mxu1 %v3075_v62  ;;  %2889 = vmatprep.mubr.msk.f32.mxu1 %vm3086_vm0, %v3075_v62  ;;  %vm1051_vm0 = vcmask 433512  }
 0x575   : > { %2886 = vmatpush3.msra.mxu1 %v3335_v54  ;;  %v1508_v29 = vpop.permute.xlu1 %1507 }
 0x576   : > { %2887 = vmatprep.subr.mxu1 %v3075_v62 }
 0x577   : > { %2888 = vmatpush3.msra.mxu1 %v3342_v55 }
 0x578   : > { %2890 = vmatmul.mubr.msk.f32.vlgmr.msra.gmra.mxu1 %vm439_vm15, %v1508_v29  ;;  %2006 = vmatprep.subr.mxu1 %v3075_v62 }
 0x625   : > { %v956_v30 = vpop.f32.mrf.mxu0  ;;  %v1043_v17 = vpop.f32.mrf.mxu1 }
 0x626   : > { %961 = vrot.lane.b32.xlu0 %v956_v30, %s3097_s26  ;;  %1048 = vrot.lane.b32.xlu1 %v1043_v17, %s3098_s27 }
 0x627   : > { %v2842_v31 = vpop.f32.mrf.mxu0  ;;  %v2849_v32 = vpop.f32.mrf.mxu1 }
 0x62a   : > { %v1137_v33 = vpop.f32.mrf.mxu0 }
 0x62b   : > { %1142 = vrot.lane.b32.xlu0 %v1137_v33, %s3099_s28 }
 0x62c   : > { %v2856_v22 = vpop.f32.mrf.mxu0 }
 0x62d   : > { %v1224_v34 = vpop.f32.mrf.mxu1  ;;  %v3476_v22 = vld [vmem:[%s3699_s1 + $0x28] ss:$0 sm:$0xff] }
 0x62e   : > { %1229 = vrot.lane.b32.xlu1 %v1224_v34, %s3100_s30  ;;  %v1311_v35 = vpop.f32.mrf.mxu0  ;;  %v3481_v34 = vld [vmem:[%s3699_s1 + $0x30] ss:$0 sm:$0xff] }
 0x62f   : > { %v2863_v36 = vpop.f32.mrf.mxu1  ;;  %1316 = vrot.lane.b32.xlu0 %v1311_v35, %s3101_s3  ;;  %s3110_s3 = smov 100  }
 0x630   : > { %v2870_v62 = vpop.f32.mrf.mxu0 }
 0x633   : > { %v1403_v37 = vpop.f32.mrf.mxu1  ;;  %v1490_v38 = vpop.f32.mrf.mxu0 }
 0x634   : > { %1408 = vrot.lane.b32.xlu1 %v1403_v37, %s3078_s29  ;;  %1495 = vrot.lane.b32.xlu0 %v1490_v38, %s3102_s7  ;;  %s3105_s29 = smov 113  }
 0x635   : > { %v2877_v39 = vpop.f32.mrf.mxu1  ;;  %v2884_v40 = vpop.f32.mrf.mxu0 }
 0x636   : > { %v3497_v40 = vld [vmem:[#allocation2 + $0x20] sm:$0xff] }
 0x638   : > { %v1577_v41 = vpop.f32.mrf.mxu1 }
 0x639   : > { %1582 = vrot.lane.b32.xlu1 %v1577_v41, %s3083_s6 }
 0x63a   : > { %v2891_v42 = vpop.f32.mrf.mxu1 }
 0x63d   : > { %1660 = vrot.lane.b32.xlu1 %v3244_v27, %s3103_s8 }
 0x641   : > { %1648 = vrot.lane.b32.xlu1 %v3244_v27, %s3104_s11 }
 0x645   : > { %1636 = vrot.lane.b32.xlu1 %v3244_v27, %s3102_s7 }
 0x698   : > { %v1049_v0 = vpop.permute.xlu1 %1048  ;;  %v962_v43 = vpop.permute.xlu0 %961 }
 0x699   : > { %965 = vst.msk [vmem:[#allocation2] sm:$0xff] %vm964_vm14, %v962_v43  ;;  %vm1695_vm14 = vcmask 367616  }
 0x69a   : > { %1052 = vst.msk [vmem:[#allocation2] sm:$0xff] %vm1051_vm0, %v1049_v0  ;;  %vm1780_vm0 = vcmp.gt.f32.partialorder %v3481_v34, 0.5 }
 0x69d   : > { %v1143_v44 = vpop.permute.xlu0 %1142 }
 0x69e   : > { %1146 = vst.msk [vmem:[#allocation2] sm:$0xff] %vm1145_vm8, %v1143_v44  ;;  %vm1809_vm8 = vcmask 621568  }
 0x6a0   : > { %v1230_v45 = vpop.permute.xlu1 %1229 }
 0x6a1   : > { %1233 = vst.msk [vmem:[#allocation2] sm:$0xff] %vm1232_vm9, %v1230_v45  ;;  %v1317_v46 = vpop.permute.xlu0 %1316 }
 0x6a2   : > { %1320 = vst.msk [vmem:[#allocation2] sm:$0xff] %vm1319_vm10, %v1317_v46 }
 0x6a6   : > { %v1409_v47 = vpop.permute.xlu1 %1408  ;;  %v1496_v48 = vpop.permute.xlu0 %1495 }
 0x6a7   : > { %1412 = vst.msk [vmem:[#allocation2] sm:$0xff] %vm1411_vm11, %v1409_v47 }
 0x6a8   : > { %1499 = vst.msk [vmem:[#allocation2] sm:$0xff] %vm1498_vm12, %v1496_v48  ;;  %v3532_v48 = vld [vmem:[%s3699_s1 + $0x10] sm:$0xff] }
 0x6ab   : > { %v1583_v27 = vpop.permute.xlu1 %1582 }
 0x6ac   : > { %1586 = vst.msk [vmem:[#allocation2] sm:$0xff] %vm1585_vm1, %v1583_v27  ;;  %v3539_v27 = vld [vmem:[%s3699_s1 + $0x48] sm:$0xff] }
 0x6af   : > { %v1661_v53 = vpop.permute.xlu1 %1660 }
 0x6b3   : > { %v1654_v8 = vld [vmem:[#allocation2] sm:$0xff]  ;;  %v1649_v54 = vpop.permute.xlu1 %1648 }
 0x6b4   : > { %1658 = vrot.lane.b32.xlu0 %v1654_v8, %s3103_s8  ;;  %1620 = vrot.lane.b32.xlu1 %v1654_v8, %s3082_s5 }
 0x6b7   : > { %v1637_v55 = vpop.permute.xlu1 %1636 }
 0x6b8   : > { %1646 = vrot.lane.b32.xlu0 %v1654_v8, %s3104_s11  ;;  %1608 = vrot.lane.b32.xlu1 %v1654_v8, %s3105_s29 }
 0x6bc   : > { %1634 = vrot.lane.b32.xlu0 %v1654_v8, %s3102_s7  ;;  %1595 = vrot.lane.b32.xlu1 %v1654_v8, %s3106_s13 }
 0x6c0   : > { %1626 = vrot.lane.b32.xlu0 %v1654_v8, %s3081_s4  ;;  %1689 = vrot.lane.b32.xlu1 %v3431_v14, %s3098_s27 }
 0x6c4   : > { %1614 = vrot.lane.b32.xlu0 %v1654_v8, %s3083_s6  ;;  %1693 = vrot.lane.b32.xlu1 %v3439_v13, %s3098_s27 }
 0x6c8   : > { %1602 = vrot.lane.b32.xlu0 %v1654_v8, %s3107_s18  ;;  %1677 = vperm.xlu1 %3035, %v3431_v14  }
 0x6cc   : > { %1687 = vrot.lane.b32.xlu0 %v1587_v50, %s3098_s27 }
 0x6d0   : > { %1691 = vrot.lane.b32.xlu0 %v1589_v51, %s3098_s27 }
 0x6d4   : > { %1682 = vperm.xlu0 %3034, %v3439_v13  }
 0x726   : > { %v1659_v56 = vpop.permute.xlu0 %1658  ;;  %v1621_v57 = vpop.permute.xlu1 %1620 }
 0x727   : > { %v1663_v58 = vsel %vm1662_vm6, %v1659_v56, %v1661_v53  ;;  %1623 = vst.msk [vmem:[#allocation4 + $0x60] sm:$0xff] %vm1598_vm3, %v1621_v57 }
 0x728   : > { %1665 = vst.msk [vmem:[#allocation4 + $0xc0] sm:$0xff] %vm1598_vm3, %v1663_v58 }
 0x72a   : > { %v1647_v59 = vpop.permute.xlu0 %1646  ;;  %v1609_v60 = vpop.permute.xlu1 %1608 }
 0x72b   : > { %v1651_v61 = vsel %vm1650_vm7, %v1647_v59, %v1649_v54  ;;  %1611 = vst.msk [vmem:[#allocation4 + $0x30] sm:$0xff] %vm1598_vm3, %v1609_v60 }
 0x72c   : > { %1653 = vst.msk [vmem:[#allocation4 + $0xa8] sm:$0xff] %vm1598_vm3, %v1651_v61 }
 0x72e   : > { %v1635_v63 = vpop.permute.xlu0 %1634  ;;  %v1596_v1 = vpop.permute.xlu1 %1595  ;;  %v1670_v11 = vld [vmem:[#allocation4 + $0x60] sm:$0xff] }
 0x72f   : > { %v1639_v2 = vsel %vm1638_vm2, %v1635_v63, %v1637_v55  ;;  %1599 = vst.msk [vmem:[#allocation4] sm:$0xff] %vm1598_vm3, %v1596_v1  ;;  %v1674_v3 = vld [vmem:[#allocation4 + $0xc0] sm:$0xff] }
 0x730   : > { %1641 = vst.msk [vmem:[#allocation4 + $0x90] sm:$0xff] %vm1598_vm3, %v1639_v2  ;;  %2892 = vmatprep.subr.mxu0 %v1674_v3 }
 0x731   : > { %2893 = vmatpush3.msra.mxu0 %v1674_v3 }
 0x732   : > { %v1627_v4 = vpop.permute.xlu0 %1626  ;;  %v1690_v10 = vpop.permute.xlu1 %1689  ;;  %v1668_v20 = vld [vmem:[#allocation4 + $0x30] sm:$0xff] }
 0x733   : > { %1629 = vst.msk [vmem:[#allocation4 + $0x78] sm:$0xff] %vm1598_vm3, %v1627_v4  ;;  %v1673_v5 = vld [vmem:[#allocation4 + $0xa8] sm:$0xff] }
 0x734   : > { %2894 = vmatprep.subr.mxu0 %v1673_v5 }
 0x735   : > { %2895 = vmatpush3.msra.mxu0 %v1673_v5 }
 0x736   : > { %v1615_v6 = vpop.permute.xlu0 %1614  ;;  %v1694_v21 = vpop.permute.xlu1 %1693  ;;  %v1666_v16 = vld [vmem:[#allocation4] sm:$0xff] }
 0x737   : > { %1617 = vst.msk [vmem:[#allocation4 + $0x48] sm:$0xff] %vm1598_vm3, %v1615_v6  ;;  %v1672_v7 = vld [vmem:[#allocation4 + $0x90] sm:$0xff] }
 0x738   : > { %2896 = vmatprep.subr.mxu0 %v1672_v7 }
 0x739   : > { %2897 = vmatpush3.msra.mxu0 %v1672_v7 }
 0x73a   : > { %v1603_v9 = vpop.permute.xlu0 %1602  ;;  %v1671_v52 = vld [vmem:[#allocation4 + $0x78] sm:$0xff] }
 0x73b   : > { %1605 = vst.msk [vmem:[#allocation4 + $0x18] sm:$0xff] %vm1598_vm3, %v1603_v9  ;;  %2898 = vmatprep.subr.mxu0 %v1671_v52 }
 0x73c   : > { %2899 = vmatpush3.msra.mxu0 %v1671_v52 }
 0x73d   : > { %2900 = vmatprep.subr.mxu0 %v1670_v11 }
 0x73e   : > { %2901 = vmatpush3.msra.mxu0 %v1670_v11  ;;  %v1669_v12 = vld [vmem:[#allocation4 + $0x48] sm:$0xff]  ;;  %v1688_v15 = vpop.permute.xlu0 %1687 }
 0x73f   : > { %2902 = vmatprep.subr.mxu0 %v1669_v12  ;;  %v1696_v19 = vsel %vm1695_vm14, %v1688_v15, %v1690_v10 }
 0x740   : > { %2903 = vmatpush3.msra.mxu0 %v1669_v12  ;;  %2910 = vmatprep.mubr.msk.f32.mxu0 %vm675_vm13, %v1696_v19 }
 0x741   : > { %2904 = vmatprep.subr.mxu0 %v1668_v20 }
 0x742   : > { %2905 = vmatpush3.msra.mxu0 %v1668_v20  ;;  %v1667_v23 = vld [vmem:[#allocation4 + $0x18] sm:$0xff]  ;;  %v1692_v24 = vpop.permute.xlu0 %1691 }
 0x743   : > { %2906 = vmatprep.subr.mxu0 %v1667_v23  ;;  %v1697_v25 = vsel %vm1695_vm14, %v1692_v24, %v1694_v21  ;;  %v1678_v29 = vpop.permute.xlu1 %1677 }
 0x744   : > { %2907 = vmatpush3.msra.mxu0 %v1667_v23 }
 0x745   : > { %2908 = vmatprep.subr.mxu0 %v1666_v16 }
 0x746   : > { %2909 = vmatpush3.msra.mxu0 %v1666_v16 }
 0x747   : > { %2911 = vmatmul.mubr.msk.f32.vlgmr.msra.gmra.mxu0 %vm675_vm13, %v1697_v25  ;;  %vm1779_vm13 = vcmp.gt.f32.partialorder %v3476_v22, 0.5 }
 0x74f   : > { %v1683_v26 = vpop.permute.xlu0 %1682 }
 0x807   : > { %v2912_v28 = vpop.f32.mrf.mxu0 }
 0x808   : > { %v1774_v30 = vadd.f32 %v2912_v28, %v1683_v26 }
 0x809   : > { %v1768_v17 = vpop.f32.mrf.mxu0 }
 0x80a   : > { %v1778_v31 = vmax.f32 %v1774_v30, 0.0  ;;  %v1769_v32 = vadd.f32 %v1768_v17, %v1678_v29 }
 0x80c   : > { %v1777_v33 = vmax.f32 %v1769_v32, 0.0  ;;  %1789 = vrot.lane.b32.xlu1 %v1778_v31, %s3109_s23 }
 0x80e   : > { %1787 = vrot.lane.b32.xlu0 %v1777_v33, %s3109_s23 }
 0x87e   : > { %v1790_v35 = vpop.permute.xlu1 %1789 }
 0x87f   : > { %v1795_v36 = vsel %vm1779_vm13, %v1790_v35, 0.0  ;;  %v1796_v62 = vsel %vm1780_vm0, %v1790_v35, 0.0 }
 0x880   : > { %v1788_v37 = vpop.permute.xlu0 %1787  ;;  %1807 = vrot.lane.b32.xlu0 %v1796_v62, %s3109_s23  ;;  %1805 = vrot.lane.b32.xlu1 %v1795_v36, %s3109_s23 }
 0x881   : > { %v1793_v38 = vsel %vm1779_vm13, %v1788_v37, 0.0  ;;  %v1794_v39 = vsel %vm1780_vm0, %v1788_v37, 0.0 }
 0x884   : > { %1803 = vrot.lane.b32.xlu0 %v1794_v39, %s3109_s23  ;;  %1801 = vrot.lane.b32.xlu1 %v1793_v38, %s3109_s23 }
 0x888   : > { %1930 = vrot.lane.b32.xlu0 %v3497_v40, %s3104_s11 }
 0x88c   : > { %1926 = vrot.lane.b32.xlu0 %v3322_v49, %s3104_s11 }
 0x890   : > { %1908 = vrot.lane.b32.xlu0 %v3497_v40, %s3102_s7 }
 0x894   : > { %1904 = vrot.lane.b32.xlu0 %v3322_v49, %s3102_s7 }
 0x898   : > { %1952 = vrot.lane.b32.xlu0 %v3497_v40, %s3103_s8 }
 0x8f2   : > { %v1808_v41 = vpop.permute.xlu0 %1807  ;;  %v1806_v42 = vpop.permute.xlu1 %1805 }
 0x8f3   : > { %v1811_v0 = vsel %vm1809_vm8, %v1806_v42, %v1808_v41 }
 0x8f4   : > { %1815 = vst.msk [vmem:[#allocation3 + $0x18] sm:$0xff] %vm876_vm5, %v1811_v0 }
 0x8f6   : > { %v1804_v43 = vpop.permute.xlu0 %1803  ;;  %v1802_v44 = vpop.permute.xlu1 %1801 }
 0x8f7   : > { %v1810_v45 = vsel %vm1809_vm8, %v1802_v44, %v1804_v43 }
 0x8f8   : > { %1814 = vst.msk [vmem:[#allocation3] sm:$0xff] %vm876_vm5, %v1810_v45 }
 0x8fa   : > { %v1931_v8 = vpop.permute.xlu0 %1930 }
 0x8fb   : > { %v1918_v46 = vld [vmem:[#allocation3 + $0x18] sm:$0xff] }
 0x8fc   : > { %1928 = vrot.lane.b32.xlu1 %v1918_v46, %s3104_s11 }
 0x8fe   : > { %v1927_v18 = vpop.permute.xlu0 %1926 }
 0x8ff   : > { %v1882_v47 = vld [vmem:[#allocation3] sm:$0xff] }
 0x900   : > { %1906 = vrot.lane.b32.xlu1 %v1918_v46, %s3102_s7  ;;  %1886 = vrot.lane.b32.xlu0 %v1882_v47, %s3081_s4 }
 0x902   : > { %v1909_v50 = vpop.permute.xlu0 %1908 }
 0x904   : > { %1888 = vrot.lane.b32.xlu1 %v1918_v46, %s3081_s4  ;;  %1874 = vrot.lane.b32.xlu0 %v1882_v47, %s3082_s5 }
 0x906   : > { %v1905_v51 = vpop.permute.xlu0 %1904 }
 0x908   : > { %1924 = vrot.lane.b32.xlu1 %v1882_v47, %s3104_s11  ;;  %1862 = vrot.lane.b32.xlu0 %v1882_v47, %s3083_s6  ;;  %s3113_s11 = smov 53  }
 0x90a   : > { %v3549_v53 = vpop.permute.xlu0 %1952 }
 0x90c   : > { %1902 = vrot.lane.b32.xlu1 %v1882_v47, %s3102_s7  ;;  %1850 = vrot.lane.b32.xlu0 %v1882_v47, %s3105_s29 }
 0x910   : > { %1876 = vrot.lane.b32.xlu1 %v1918_v46, %s3082_s5  ;;  %1838 = vrot.lane.b32.xlu0 %v1882_v47, %s3107_s18 }
 0x914   : > { %1864 = vrot.lane.b32.xlu1 %v1918_v46, %s3083_s6  ;;  %1826 = vrot.lane.b32.xlu0 %v1882_v47, %s3106_s13  ;;  %s3112_s6 = smov 73  }
 0x918   : > { %1852 = vrot.lane.b32.xlu1 %v1918_v46, %s3105_s29  ;;  %1948 = vrot.lane.b32.xlu0 %v3322_v49, %s3103_s8  ;;  %v3111_v49 = vmov 44   ;;  %s3114_s29 = smov 83  }
 0x919   : > { %3037 = vset.pattern.permute.xlu0 %v3111_v49  ;;  %3036 = vset.pattern.permute.xlu1 %v3111_v49 }
 0x91c   : > { %1840 = vrot.lane.b32.xlu1 %v1918_v46, %s3107_s18  ;;  %1992 = vrot.lane.b32.xlu0 %v3532_v48, %s3110_s3  ;;  %s3119_s18 = smov 1  }
 0x920   : > { %1828 = vrot.lane.b32.xlu1 %v1918_v46, %s3106_s13  ;;  %1996 = vrot.lane.b32.xlu0 %v3539_v27, %s3110_s3 }
 0x924   : > { %1950 = vrot.lane.b32.xlu1 %v1918_v46, %s3103_s8  ;;  %1980 = vperm.xlu0 %3037, %v3532_v48  }
 0x928   : > { %1946 = vrot.lane.b32.xlu1 %v1882_v47, %s3103_s8 }
 0x92c   : > { %1990 = vrot.lane.b32.xlu1 %v3431_v14, %s3110_s3 }
 0x930   : > { %1994 = vrot.lane.b32.xlu1 %v3439_v13, %s3110_s3 }
 0x934   : > { %1985 = vperm.xlu1 %3036, %v3539_v27  }
 0x96e   : > { %v1929_v54 = vpop.permute.xlu1 %1928 }
 0x96f   : > { %v1933_v55 = vsel %vm1650_vm7, %v1929_v54, %v1931_v8 }
 0x970   : > { %1937 = vst.msk [vmem:[#allocation4 + $0x168] sm:$0xff] %vm1598_vm3, %v1933_v55 }
 0x972   : > { %v1887_v56 = vpop.permute.xlu0 %1886  ;;  %v1907_v57 = vpop.permute.xlu1 %1906 }
 0x973   : > { %1892 = vst.msk [vmem:[#allocation4 + $0xf0] sm:$0xff] %vm1598_vm3, %v1887_v56  ;;  %v1911_v14 = vsel %vm1638_vm2, %v1907_v57, %v1909_v50 }
 0x974   : > { %1915 = vst.msk [vmem:[#allocation4 + $0x138] sm:$0xff] %vm1598_vm3, %v1911_v14 }
 0x976   : > { %v1875_v13 = vpop.permute.xlu0 %1874  ;;  %v1889_v58 = vpop.permute.xlu1 %1888 }
 0x977   : > { %1880 = vst.msk [vmem:[#allocation4 + $0xc0] sm:$0xff] %vm1598_vm3, %v1875_v13  ;;  %1893 = vst.msk [vmem:[#allocation4 + $0x108] sm:$0xff] %vm1598_vm3, %v1889_v58  ;;  %v1975_v59 = vld [vmem:[#allocation4 + $0x168] sm:$0xff] }
 0x978   : > { %2007 = vmatpush1.msra.mxu1 %v1975_v59 }
 0x979   : > { %2008 = vmatprep.subr.mxu1 %v3497_v40 }
 0x97a   : > { %v1863_v60 = vpop.permute.xlu0 %1862  ;;  %v1925_v61 = vpop.permute.xlu1 %1924  ;;  %v1970_v19 = vld [vmem:[#allocation4 + $0xf0] sm:$0xff] }
 0x97b   : > { %1868 = vst.msk [vmem:[#allocation4 + $0x90] sm:$0xff] %vm1598_vm3, %v1863_v60  ;;  %v1932_v63 = vsel %vm1650_vm7, %v1925_v61, %v1927_v18  ;;  %v1973_v7 = vld [vmem:[#allocation4 + $0x138] sm:$0xff] }
 0x97c   : > { %1936 = vst.msk [vmem:[#allocation4 + $0x150] sm:$0xff] %vm1598_vm3, %v1932_v63 }
 0x97e   : > { %v1851_v1 = vpop.permute.xlu0 %1850  ;;  %v1903_v2 = vpop.permute.xlu1 %1902  ;;  %v1971_v11 = vld [vmem:[#allocation4 + $0x108] sm:$0xff]  ;;  %v1968_v24 = vld [vmem:[#allocation4 + $0xc0] sm:$0xff] }
 0x97f   : > { %1856 = vst.msk [vmem:[#allocation4 + $0x60] sm:$0xff] %vm1598_vm3, %v1851_v1  ;;  %v1910_v3 = vsel %vm1638_vm2, %v1903_v2, %v1905_v51 }
 0x980   : > { %1914 = vst.msk [vmem:[#allocation4 + $0x120] sm:$0xff] %vm1598_vm3, %v1910_v3 }
 0x982   : > { %v1839_v4 = vpop.permute.xlu0 %1838  ;;  %v1877_v5 = vpop.permute.xlu1 %1876  ;;  %v1966_v26 = vld [vmem:[#allocation4 + $0x90] sm:$0xff] }
 0x983   : > { %1844 = vst.msk [vmem:[#allocation4 + $0x30] sm:$0xff] %vm1598_vm3, %v1839_v4  ;;  %1881 = vst.msk [vmem:[#allocation4 + $0xd8] sm:$0xff] %vm1598_vm3, %v1877_v5  ;;  %v1974_v6 = vld [vmem:[#allocation4 + $0x150] sm:$0xff]  ;;  %v3626_v5 = vld [vmem:[%s3699_s1 + $0x80] sm:$0xff] }
 0x984   : > { %2009 = vmatpush1.msra.mxu1 %v1974_v6 }
 0x985   : > { %2010 = vmatprep.subr.mxu1 %v3497_v40 }
 0x986   : > { %v1827_v9 = vpop.permute.xlu0 %1826  ;;  %2011 = vmatpush1.msra.mxu1 %v1973_v7  ;;  %v1865_v52 = vpop.permute.xlu1 %1864  ;;  %v1964_v17 = vld [vmem:[#allocation4 + $0x60] sm:$0xff] }
 0x987   : > { %1832 = vst.msk [vmem:[#allocation4] sm:$0xff] %vm1598_vm3, %v1827_v9  ;;  %1869 = vst.msk [vmem:[#allocation4 + $0xa8] sm:$0xff] %vm1598_vm3, %v1865_v52  ;;  %2012 = vmatprep.subr.mxu1 %v3497_v40  ;;  %v1972_v10 = vld [vmem:[#allocation4 + $0x120] sm:$0xff] }
 0x988   : > { %2013 = vmatpush1.msra.mxu1 %v1972_v10 }
 0x989   : > { %2014 = vmatprep.subr.mxu1 %v3497_v40 }
 0x98a   : > { %v1949_v12 = vpop.permute.xlu0 %1948  ;;  %2015 = vmatpush1.msra.mxu1 %v1971_v11  ;;  %v1853_v15 = vpop.permute.xlu1 %1852  ;;  %v1969_v20 = vld [vmem:[#allocation4 + $0xd8] sm:$0xff]  ;;  %v1962_v35 = vld [vmem:[#allocation4 + $0x30] sm:$0xff] }
 0x98b   : > { %1857 = vst.msk [vmem:[#allocation4 + $0x78] sm:$0xff] %vm1598_vm3, %v1853_v15  ;;  %2016 = vmatprep.subr.mxu1 %v3497_v40 }
 0x98c   : > { %2017 = vmatpush1.msra.mxu1 %v1970_v19 }
 0x98d   : > { %2018 = vmatprep.subr.mxu1 %v3497_v40 }
 0x98e   : > { %2019 = vmatpush1.msra.mxu1 %v1969_v20  ;;  %v1841_v21 = vpop.permute.xlu1 %1840  ;;  %v1993_v23 = vpop.permute.xlu0 %1992  ;;  %v1967_v16 = vld [vmem:[#allocation4 + $0xa8] sm:$0xff]  ;;  %v1960_v37 = vld [vmem:[#allocation4] sm:$0xff] }
 0x98f   : > { %1845 = vst.msk [vmem:[#allocation4 + $0x48] sm:$0xff] %vm1598_vm3, %v1841_v21  ;;  %2020 = vmatprep.subr.mxu1 %v3497_v40  ;;  %2731 = vmatprep.mubr.msk.f32.mxu1 %vm439_vm15, %v1993_v23 }
 0x990   : > { %2021 = vmatpush1.msra.mxu1 %v1968_v24 }
 0x991   : > { %2022 = vmatprep.subr.mxu1 %v3497_v40 }
 0x992   : > { %2023 = vmatpush1.msra.mxu1 %v1967_v16  ;;  %v1829_v25 = vpop.permute.xlu1 %1828  ;;  %v1965_v28 = vld [vmem:[#allocation4 + $0x78] sm:$0xff]  ;;  %v1997_v42 = vpop.permute.xlu0 %1996 }
 0x993   : > { %1833 = vst.msk [vmem:[#allocation4 + $0x18] sm:$0xff] %vm1598_vm3, %v1829_v25  ;;  %2024 = vmatprep.subr.mxu1 %v3497_v40 }
 0x994   : > { %2025 = vmatpush1.msra.mxu1 %v1966_v26 }
 0x995   : > { %2026 = vmatprep.subr.mxu1 %v3497_v40 }
 0x996   : > { %2027 = vmatpush1.msra.mxu1 %v1965_v28  ;;  %v1951_v29 = vpop.permute.xlu1 %1950  ;;  %v1963_v31 = vld [vmem:[#allocation4 + $0x48] sm:$0xff] }
 0x997   : > { %v1955_v30 = vsel %vm1662_vm6, %v1951_v29, %v3549_v53  ;;  %2028 = vmatprep.subr.mxu1 %v3497_v40  ;;  %v3642_v29 = vld [vmem:[%s3699_s1 + $0xb8] sm:$0xff] }
 0x998   : > { %1959 = vst.msk [vmem:[#allocation4 + $0x198] sm:$0xff] %vm1598_vm3, %v1955_v30  ;;  %2029 = vmatpush1.msra.mxu1 %v1964_v17 }
 0x999   : > { %2030 = vmatprep.subr.mxu1 %v3497_v40 }
 0x99a   : > { %2031 = vmatpush1.msra.mxu1 %v1963_v31  ;;  %v1947_v32 = vpop.permute.xlu1 %1946  ;;  %v1961_v36 = vld [vmem:[#allocation4 + $0x18] sm:$0xff] }
 0x99b   : > { %v1954_v33 = vsel %vm1662_vm6, %v1947_v32, %v1949_v12  ;;  %2032 = vmatprep.subr.mxu1 %v3497_v40 }
 0x99c   : > { %1958 = vst.msk [vmem:[#allocation4 + $0x180] sm:$0xff] %vm1598_vm3, %v1954_v33  ;;  %2033 = vmatpush1.msra.mxu1 %v1962_v35 }
 0x99d   : > { %2034 = vmatprep.subr.mxu1 %v3497_v40 }
 0x99e   : > { %2035 = vmatpush1.msra.mxu1 %v1961_v36  ;;  %v1991_v62 = vpop.permute.xlu1 %1990 }
 0x99f   : > { %2036 = vmatprep.subr.mxu1 %v3497_v40  ;;  %v1977_v38 = vld [vmem:[#allocation4 + $0x198] sm:$0xff]  ;;  %v1998_v39 = vsel %vm1598_vm3, %v1991_v62, %v1993_v23  ;;  %v1981_v47 = vpop.permute.xlu0 %1980 }
 0x9a0   : > { %2037 = vmatpush1.msra.mxu1 %v1960_v37 }
 0x9a1   : > { %2066 = vmatprep.subr.mxu1 %v3497_v40 }
 0x9a2   : > { %2067 = vmatpush2.msra.mxu1 %v1977_v38  ;;  %v1995_v0 = vpop.permute.xlu1 %1994 }
 0x9a3   : > { %2068 = vmatprep.subr.mxu1 %v3497_v40  ;;  %v1976_v41 = vld [vmem:[#allocation4 + $0x180] sm:$0xff]  ;;  %v1999_v43 = vsel %vm1598_vm3, %v1995_v0, %v1997_v42 }
 0x9a4   : > { %2069 = vmatpush2.msra.mxu1 %v1976_v41 }
 0x9a5   : > { %2071 = vmatmul.mubr.f32.vlgmr.msra.gmra.mxu1 %v1998_v39 }
 0x9a6   : > { %2732 = vmatprep.mubr.msk.f32.mxu1 %vm439_vm15, %v1997_v42 }
 0x9a9   : > { %2076 = vmatmul.mubr.f32.gmra.mxu1 %v1999_v43 }
 0x9af   : > { %v1986_v46 = vpop.permute.xlu1 %1985 }
 0xa65   : > { %v2072_v44 = vpop.f32.mrf.mxu1 }
 0xa66   : > { %v2073_v50 = vadd.f32 %v2072_v44, %v1981_v47 }
 0xa67   : > { %v2074_v45 = vpop.f32.mrf.mxu1 }
 0xa68   : > { %v2081_v40 = vmax.f32 %v2073_v50, 0.0 }
 0xa69   : > { %v2077_v49 = vpop.f32.mrf.mxu1 }
 0xa6a   : > { %v2078_v8 = vadd.f32 %v2077_v49, %v1986_v46 }
 0xa6b   : > { %v2079_v18 = vpop.f32.mrf.mxu1 }
 0xa6c   : > { %v2082_v51 = vmax.f32 %v2078_v8, 0.0 }
 0xa6e   : > { %2093 = vrot.lane.b32.xlu1 %v2082_v51, %s3109_s23 }
 0xa72   : > { %2091 = vrot.lane.b32.xlu1 %v2081_v40, %s3109_s23 }
 0xae0   : > { %v2094_v53 = vpop.permute.xlu1 %2093 }
 0xae1   : > { %v2099_v54 = vsel %vm1779_vm13, %v2094_v53, 0.0  ;;  %v2100_v55 = vsel %vm1780_vm0, %v2094_v53, 0.0 }
 0xae2   : > { %2111 = vrot.lane.b32.xlu1 %v2100_v55, %s3109_s23  ;;  %2109 = vrot.lane.b32.xlu0 %v2099_v54, %s3109_s23 }
 0xae4   : > { %v2092_v56 = vpop.permute.xlu1 %2091 }
 0xae5   : > { %v2097_v57 = vsel %vm1779_vm13, %v2092_v56, 0.0  ;;  %v2098_v14 = vsel %vm1780_vm0, %v2092_v56, 0.0 }
 0xae6   : > { %2107 = vrot.lane.b32.xlu1 %v2098_v14, %s3109_s23  ;;  %2105 = vrot.lane.b32.xlu0 %v2097_v57, %s3109_s23 }
 0xb54   : > { %v2110_v13 = vpop.permute.xlu0 %2109  ;;  %v2112_v58 = vpop.permute.xlu1 %2111 }
 0xb55   : > { %v2114_v59 = vsel %vm1809_vm8, %v2110_v13, %v2112_v58 }
 0xb56   : > { %2118 = vst.msk [vmem:[#allocation2 + $0x18] sm:$0xff] %vm876_vm5, %v2114_v59 }
 0xb58   : > { %v2106_v60 = vpop.permute.xlu0 %2105  ;;  %v2108_v61 = vpop.permute.xlu1 %2107 }
 0xb59   : > { %v2113_v63 = vsel %vm1809_vm8, %v2106_v60, %v2108_v61 }
 0xb5a   : > { %2117 = vst.msk [vmem:[#allocation2] sm:$0xff] %vm876_vm5, %v2113_v63 }
 0xb5d   : > { %v2120_v22 = vld [vmem:[#allocation2 + $0x18] sm:$0xff] }
 0xb5e   : > { %2125 = vrot.lane.b32.xlu0 %v2120_v22, %s3089_s12 }
 0xb61   : > { %v2119_v34 = vld [vmem:[#allocation2] sm:$0xff] }
 0xb62   : > { %2123 = vrot.lane.b32.xlu1 %v2119_v34, %s3089_s12 }
 0xbd0   : > { %v2126_v3 = vpop.permute.xlu0 %2125 }
 0xbd1   : > { %v2130_v4 = vadd.f32 %v2126_v3, %v2120_v22 }
 0xbd4   : > { %v2124_v1 = vpop.permute.xlu1 %2123 }
 0xbd5   : > { %v2129_v2 = vadd.f32 %v2124_v1, %v2119_v34 }
 0xbd7   : > { %2149 = vrot.lane.b32.xlu1 %v2129_v2, %s3112_s6  ;;  %2133 = vrot.lane.b32.xlu0 %v2129_v2, %s3103_s8 }
 0xbdb   : > { %2151 = vrot.lane.b32.xlu1 %v2130_v4, %s3112_s6  ;;  %2135 = vrot.lane.b32.xlu0 %v2130_v4, %s3103_s8 }
 0xbdf   : > { %2167 = vrot.lane.b32.xlu1 %v2129_v2, %s3113_s11  ;;  %2169 = vrot.lane.b32.xlu0 %v2130_v4, %s3113_s11 }
 0xbe3   : > { %2185 = vrot.lane.b32.xlu1 %v2129_v2, %s3095_s24  ;;  %2187 = vrot.lane.b32.xlu0 %v2130_v4, %s3095_s24 }
 0xbe7   : > { %2215 = vrot.lane.b32.xlu1 %v3532_v48, %s3114_s29 }
 0xbeb   : > { %2219 = vrot.lane.b32.xlu1 %v3626_v5, %s3114_s29 }
 0xc49   : > { %v2150_v6 = vpop.permute.xlu1 %2149  ;;  %v2134_v7 = vpop.permute.xlu0 %2133 }
 0xc4a   : > { %v2139_v9 = vsel %vm848_vm4, %v2134_v7, 0.0  ;;  %v2155_v11 = vsel %vm848_vm4, %v2150_v6, 0.0 }
 0xc4b   : > { %2140 = vadd.xlane.f32.xlu0 %v2139_v9 }
 0xc4d   : > { %v2152_v52 = vpop.permute.xlu1 %2151  ;;  %v2136_v10 = vpop.permute.xlu0 %2135 }
 0xc4e   : > { %v2158_v12 = vsel %vm848_vm4, %v2152_v52, 0.0  ;;  %v2142_v28 = vsel %vm848_vm4, %v2136_v10, 0.0 }
 0xc4f   : > { %2159 = vadd.xlane.f32.xlu1 %v2158_v12  ;;  %2156 = vadd.xlane.f32.xlu0 %v2155_v11 }
 0xc51   : > { %v2168_v15 = vpop.permute.xlu1 %2167  ;;  %v2170_v19 = vpop.permute.xlu0 %2169 }
 0xc52   : > { %v2173_v20 = vsel %vm848_vm4, %v2168_v15, 0.0  ;;  %v2176_v21 = vsel %vm848_vm4, %v2170_v19, 0.0 }
 0xc53   : > { %2174 = vadd.xlane.f32.xlu0 %v2173_v20  ;;  %2177 = vadd.xlane.f32.xlu1 %v2176_v21 }
 0xc55   : > { %v2186_v23 = vpop.permute.xlu1 %2185  ;;  %v2188_v24 = vpop.permute.xlu0 %2187 }
 0xc56   : > { %v2191_v16 = vsel %vm848_vm4, %v2186_v23, 0.0  ;;  %v2194_v25 = vsel %vm848_vm4, %v2188_v24, 0.0  ;;  %vm2340_vm4 = vcmask 261120  }
 0xc57   : > { %2192 = vadd.xlane.f32.xlu0 %v2191_v16  ;;  %2195 = vadd.xlane.f32.xlu1 %v2194_v25 }
 0xc59   : > { %v2216_v26 = vpop.permute.xlu1 %2215 }
 0xc5a   : > { %2917 = vmatprep.mubr.msk.f32.mxu0 %vm439_vm15, %v2216_v26 }
 0xc5b   : > { %2143 = vadd.xlane.f32.xlu0 %v2142_v28 }
 0xc5d   : > { %v2220_v17 = vpop.permute.xlu1 %2219 }
 0xc68   : > { %2221 = vrot.lane.b32.xlu1 %v3642_v29, %s3114_s29 }
 0xc6c   : > { %2227 = vrot.lane.b32.xlu1 %v3626_v5, %s3115_s14 }
 0xc70   : > { %2223 = vrot.lane.b32.xlu1 %v3532_v48, %s3115_s14 }
 0xc71   : > { %2217 = vrot.lane.b32.xlu0 %v3539_v27, %s3114_s29 }
 0xc74   : > { %2334 = vrot.lane.b32.xlu1 %v3539_v27, %s3116_s15 }
 0xc75   : > { %2229 = vrot.lane.b32.xlu0 %v3642_v29, %s3115_s14 }
 0xc78   : > { %2338 = vrot.lane.b32.xlu1 %v3642_v29, %s3116_s15 }
 0xc79   : > { %2225 = vrot.lane.b32.xlu0 %v3539_v27, %s3115_s14 }
 0xc7c   : > { %2472 = vrot.lane.b32.xlu1 %v3539_v27, %s3117_s16 }
 0xc7d   : > { %2332 = vrot.lane.b32.xlu0 %v3532_v48, %s3116_s15 }
 0xc80   : > { %2476 = vrot.lane.b32.xlu1 %v3642_v29, %s3117_s16 }
 0xc81   : > { %2336 = vrot.lane.b32.xlu0 %v3626_v5, %s3116_s15 }
 0xc84   : > { %2621 = vrot.lane.b32.xlu1 %v3539_v27, %s3118_s17 }
 0xc85   : > { %2470 = vrot.lane.b32.xlu0 %v3532_v48, %s3117_s16 }
 0xc88   : > { %2625 = vrot.lane.b32.xlu1 %v3642_v29, %s3118_s17 }
 0xc89   : > { %2474 = vrot.lane.b32.xlu0 %v3626_v5, %s3117_s16 }
 0xc8c   : > { %2637 = vrot.lane.b32.xlu1 %v3539_v27, %s3119_s18 }
 0xc8d   : > { %2619 = vrot.lane.b32.xlu0 %v3532_v48, %s3118_s17 }
 0xc90   : > { %2641 = vrot.lane.b32.xlu1 %v3642_v29, %s3119_s18 }
 0xc91   : > { %2623 = vrot.lane.b32.xlu0 %v3626_v5, %s3118_s17 }
 0xc95   : > { %2635 = vrot.lane.b32.xlu0 %v3532_v48, %s3119_s18 }
 0xc99   : > { %2639 = vrot.lane.b32.xlu0 %v3626_v5, %s3119_s18 }
 0xcd4   : > { %v2141_v30 = vpop.xlane.xlu0 %2140 }
 0xcd5   : > { %v2145_v37 = vmul.f32 0.0625, %v2141_v30 }
 0xcd8   : > { %v2157_v31 = vpop.xlane.xlu0 %2156  ;;  %v2160_v32 = vpop.xlane.xlu1 %2159 }
 0xcd9   : > { %v2161_v62 = vmul.f32 0.0625, %v2157_v31  ;;  %v2162_v41 = vmul.f32 0.0625, %v2160_v32 }
 0xcdb   : > { %v2163_v42 = vadd.f32 %v2161_v62, %v2145_v37  ;;  %v2165_v40 = vmax.f32 %v2145_v37, %v2161_v62 }
 0xcdc   : > { %v2175_v33 = vpop.xlane.xlu0 %2174  ;;  %v2178_v35 = vpop.xlane.xlu1 %2177 }
 0xcdd   : > { %v2179_v38 = vmul.f32 0.0625, %v2175_v33  ;;  %v2180_v45 = vmul.f32 0.0625, %v2178_v35 }
 0xcdf   : > { %v2181_v46 = vadd.f32 %v2179_v38, %v2163_v42  ;;  %v2183_v54 = vmax.f32 %v2165_v40, %v2179_v38 }
 0xce0   : > { %v2193_v36 = vpop.xlane.xlu0 %2192  ;;  %v2196_v44 = vpop.xlane.xlu1 %2195 }
 0xce1   : > { %v2197_v0 = vmul.f32 0.0625, %v2193_v36  ;;  %v2198_v8 = vmul.f32 0.0625, %v2196_v44 }
 0xce3   : > { %v2199_v18 = vadd.f32 %v2197_v0, %v2181_v46  ;;  %v2201_v14 = vmax.f32 %v2183_v54, %v2197_v0 }
 0xce4   : > { %v2144_v39 = vpop.xlane.xlu0 %2143  ;;  %v2222_v60 = vpop.permute.xlu1 %2221 }
 0xce5   : > { %v2146_v43 = vmul.f32 0.0625, %v2144_v39  ;;  %v2203_v55 = vmul.f32 0.25, %v2199_v18 }
 0xce7   : > { %v2164_v47 = vadd.f32 %v2162_v41, %v2146_v43  ;;  %v2166_v49 = vmax.f32 %v2146_v43, %v2162_v41  ;;  %v2205_v58 = vadd.f32 %v2203_v55, %v2201_v14 }
 0xce8   : > { %v2218_v59 = vpop.permute.xlu0 %2217  ;;  %v2228_v34 = vpop.permute.xlu1 %2227 }
 0xce9   : > { %v2182_v50 = vadd.f32 %v2180_v45, %v2164_v47  ;;  %v2184_v51 = vmax.f32 %v2166_v49, %v2180_v45 }
 0xceb   : > { %v2200_v53 = vadd.f32 %v2198_v8, %v2182_v50  ;;  %v2202_v56 = vmax.f32 %v2184_v51, %v2198_v8 }
 0xcec   : > { %v2230_v61 = vpop.permute.xlu0 %2229  ;;  %v2224_v6 = vpop.permute.xlu1 %2223 }
 0xced   : > { %v2204_v57 = vmul.f32 0.25, %v2200_v53 }
 0xcef   : > { %v2206_v13 = vadd.f32 %v2204_v57, %v2202_v56 }
 0xcf0   : > { %v2226_v63 = vpop.permute.xlu0 %2225  ;;  %v2335_v19 = vpop.permute.xlu1 %2334 }
 0xcf1   : > { %2913 = vmatprep.subr.mxu0 %v2206_v13 }
 0xcf2   : > { %2914 = vmatpush3.msra.mxu0 %v2206_v13 }
 0xcf3   : > { %2915 = vmatprep.subr.mxu0 %v2205_v58 }
 0xcf4   : > { %2916 = vmatpush3.msra.mxu0 %v2205_v58  ;;  %v2333_v22 = vpop.permute.xlu0 %2332  ;;  %v2339_v23 = vpop.permute.xlu1 %2338 }
 0xcf5   : > { %2918 = vmatmul.mubr.msk.f32.vlgmr.msra.gmra.mxu0 %vm439_vm15, %v2218_v59 }
 0xcf6   : > { %2920 = vmatprep.mubr.msk.f32.mxu0 %vm439_vm15, %v2220_v17 }
 0xcf8   : > { %v2337_v21 = vpop.permute.xlu0 %2336  ;;  %v2473_v13 = vpop.permute.xlu1 %2472 }
 0xcf9   : > { %2921 = vmatmul.mubr.msk.f32.gmra.mxu0 %vm439_vm15, %v2222_v60  ;;  %vm2575_vm15 = vcmask 7168  }
 0xcfa   : > { %2931 = vmatprep.mubr.msk.f32.mxu0 %vm2340_vm4, %v2333_v22 }
 0xcfc   : > { %v2471_v24 = vpop.permute.xlu0 %2470  ;;  %v2477_v60 = vpop.permute.xlu1 %2476 }
 0xd00   : > { %v2475_v59 = vpop.permute.xlu0 %2474 }
 0xdb5   : > { %v2919_v1 = vpop.f32.mrf.mxu0 }
 0xdb6   : > { %v2315_v9 = vadd.f32 %v2919_v1, %v2226_v63 }
 0xdb7   : > { %v2309_v2 = vpop.f32.mrf.mxu0 }
 0xdb8   : > { %v2310_v11 = vadd.f32 %v2309_v2, %v2224_v6  ;;  %v2329_v15 = vmax.f32 %v2315_v9, 0.0 }
 0xdb9   : > { %v2922_v3 = vpop.f32.mrf.mxu0 }
 0xdba   : > { %v2325_v4 = vadd.f32 %v2922_v3, %v2230_v61  ;;  %v2328_v20 = vmax.f32 %v2310_v11, 0.0 }
 0xdbb   : > { %v2319_v7 = vpop.f32.mrf.mxu0 }
 0xdbc   : > { %v2331_v52 = vmax.f32 %v2325_v4, 0.0  ;;  %v2320_v10 = vadd.f32 %v2319_v7, %v2228_v34 }
 0xdbe   : > { %v2330_v12 = vmax.f32 %v2320_v10, 0.0  ;;  %2923 = vmatprep.subr.mxu0 %v2331_v52 }
 0xdbf   : > { %2924 = vmatpush3.msra.mxu0 %v2331_v52 }
 0xdc0   : > { %2925 = vmatprep.subr.mxu0 %v2330_v12 }
 0xdc1   : > { %2926 = vmatpush3.msra.mxu0 %v2330_v12 }
 0xdc2   : > { %2927 = vmatprep.subr.mxu0 %v2329_v15 }
 0xdc3   : > { %2928 = vmatpush3.msra.mxu0 %v2329_v15 }
 0xdc4   : > { %2929 = vmatprep.subr.mxu0 %v2328_v20 }
 0xdc5   : > { %2930 = vmatpush3.msra.mxu0 %v2328_v20 }
 0xdc6   : > { %2932 = vmatmul.mubr.msk.f32.vlgmr.msra.gmra.mxu0 %vm2340_vm4, %v2335_v19 }
 0xdc7   : > { %2934 = vmatprep.mubr.msk.f32.mxu0 %vm2340_vm4, %v2337_v21 }
 0xdca   : > { %2935 = vmatmul.mubr.msk.f32.gmra.mxu0 %vm2340_vm4, %v2339_v23 }
 0xdcb   : > { %2945 = vmatprep.mubr.msk.f32.mxu0 %vm2340_vm4, %v2471_v24 }
 0xe86   : > { %v2933_v16 = vpop.f32.mrf.mxu0 }
 0xe87   : > { %v2439_v25 = vmul.f32 0.044715, %v2933_v16  ;;  %v2435_v55 = vmul.f32 0.5, %v2933_v16 }
 0xe88   : > { %v2415_v26 = vpop.f32.mrf.mxu0 }
 0xe89   : > { %v2443_v28 = vmul.f32 %v2933_v16, %v2439_v25  ;;  %v2438_v30 = vmul.f32 0.044715, %v2415_v26  ;;  %v2434_v14 = vmul.f32 0.5, %v2415_v26 }
 0xe8a   : > { %v2936_v17 = vpop.f32.mrf.mxu0 }
 0xe8b   : > { %v2447_v31 = vmul.f32 %v2933_v16, %v2443_v28  ;;  %v2442_v32 = vmul.f32 %v2438_v30, %v2415_v26  ;;  %v2441_v33 = vmul.f32 0.044715, %v2936_v17  ;;  %v2437_v49 = vmul.f32 0.5, %v2936_v17 }
 0xe8c   : > { %v2425_v35 = vpop.f32.mrf.mxu0 }
 0xe8d   : > { %v2446_v36 = vmul.f32 %v2442_v32, %v2415_v26  ;;  %v2445_v62 = vmul.f32 %v2936_v17, %v2441_v33  ;;  %v2440_v37 = vmul.f32 0.044715, %v2425_v35  ;;  %v2451_v48 = vadd.f32 %v2933_v16, %v2447_v31 }
 0xe8e   : > { %v2436_v51 = vmul.f32 0.5, %v2425_v35 }
 0xe8f   : > { %v2449_v38 = vmul.f32 %v2936_v17, %v2445_v62  ;;  %v2444_v27 = vmul.f32 %v2440_v37, %v2425_v35  ;;  %v2450_v39 = vadd.f32 %v2446_v36, %v2415_v26  ;;  %v2455_v5 = vmul.f32 0.7978846, %v2451_v48 }
 0xe91   : > { %v2448_v41 = vmul.f32 %v2444_v27, %v2425_v35  ;;  %v2453_v29 = vadd.f32 %v2936_v17, %v2449_v38  ;;  %v2454_v42 = vmul.f32 0.7978846, %v2450_v39  ;;  %3038 = vtanh.f32 %v2455_v5 }
 0xe93   : > { %v2457_v0 = vmul.f32 0.7978846, %v2453_v29  ;;  %v2452_v43 = vadd.f32 %v2448_v41, %v2425_v35 }
 0xe95   : > { %3040 = vtanh.f32 %v2457_v0  ;;  %v2456_v44 = vmul.f32 0.7978846, %v2452_v43 }
 0xe96   : > { %3042 = vtanh.f32 %v2454_v42 }
 0xe97   : > { %3044 = vtanh.f32 %v2456_v44  ;;  %v2622_v44 = vpop.permute.xlu1 %2621 }
 0xe9e   : > { %v3039_v45 = vpop.eup %3038 }
 0xe9f   : > { %v2463_v53 = vadd.f32 1.0, %v3039_v45  ;;  %v2620_v45 = vpop.permute.xlu0 %2619 }
 0xea1   : > { %v2467_v57 = vmul.f32 %v2463_v53, %v2435_v55 }
 0xea2   : > { %v3041_v46 = vpop.eup %3040 }
 0xea3   : > { %v3043_v47 = vpop.eup %3042  ;;  %v2465_v8 = vadd.f32 1.0, %v3041_v46 }
 0xea4   : > { %v3045_v18 = vpop.eup %3044  ;;  %v2462_v56 = vadd.f32 1.0, %v3043_v47  ;;  %v2626_v47 = vpop.permute.xlu1 %2625 }
 0xea5   : > { %v2469_v50 = vmul.f32 %v2465_v8, %v2437_v49  ;;  %v2464_v40 = vadd.f32 1.0, %v3045_v18  ;;  %v2624_v49 = vpop.permute.xlu0 %2623 }
 0xea6   : > { %v2466_v58 = vmul.f32 %v2462_v56, %v2434_v14 }
 0xea7   : > { %2937 = vmatprep.subr.mxu0 %v2469_v50  ;;  %v2468_v54 = vmul.f32 %v2464_v40, %v2436_v51 }
 0xea8   : > { %2938 = vmatpush3.msra.mxu0 %v2469_v50  ;;  %v2638_v8 = vpop.permute.xlu1 %2637 }
 0xea9   : > { %2939 = vmatprep.subr.mxu0 %v2468_v54  ;;  %v2636_v18 = vpop.permute.xlu0 %2635 }
 0xeaa   : > { %2940 = vmatpush3.msra.mxu0 %v2468_v54 }
 0xeab   : > { %2941 = vmatprep.subr.mxu0 %v2467_v57 }
 0xeac   : > { %2942 = vmatpush3.msra.mxu0 %v2467_v57  ;;  %v2642_v55 = vpop.permute.xlu1 %2641 }
 0xead   : > { %2943 = vmatprep.subr.mxu0 %v2466_v58  ;;  %v2640_v56 = vpop.permute.xlu0 %2639 }
 0xeae   : > { %2944 = vmatpush3.msra.mxu0 %v2466_v58 }
 0xeaf   : > { %2946 = vmatmul.mubr.msk.f32.vlgmr.msra.gmra.mxu0 %vm2340_vm4, %v2473_v13 }
 0xeb0   : > { %2948 = vmatprep.mubr.msk.f32.mxu0 %vm2340_vm4, %v2475_v59 }
 0xeb3   : > { %2949 = vmatmul.mubr.msk.f32.gmra.mxu0 %vm2340_vm4, %v2477_v60 }
 0xf6f   : > { %v2947_v61 = vpop.f32.mrf.mxu0 }
 0xf70   : > { %v2572_v22 = vadd.f32 %v2947_v61, %v2933_v16 }
 0xf71   : > { %v2552_v63 = vpop.f32.mrf.mxu0 }
 0xf72   : > { %v2571_v34 = vadd.f32 %v2552_v63, %v2415_v26  ;;  %v2577_v4 = vsel %vm2575_vm15, %v2572_v22, 0.0 }
 0xf73   : > { %v2950_v1 = vpop.f32.mrf.mxu0 }
 0xf74   : > { %v2576_v2 = vsel %vm2575_vm15, %v2571_v34, 0.0  ;;  %v2574_v6 = vadd.f32 %v2950_v1, %v2936_v17 }
 0xf75   : > { %v2562_v3 = vpop.f32.mrf.mxu0  ;;  %v2578_v9 = vadd.f32 %v2577_v4, %v2576_v2 }
 0xf76   : > { %v2573_v7 = vadd.f32 %v2562_v3, %v2425_v35  ;;  %v2581_v11 = vsel %vm2575_vm15, %v2574_v6, 0.0 }
 0xf78   : > { %v2579_v52 = vsel %vm2575_vm15, %v2573_v7, 0.0 }
 0xf79   : > { %v2580_v10 = vadd.f32 %v2579_v52, %v2578_v9 }
 0xf7b   : > { %v2582_v12 = vadd.f32 %v2581_v11, %v2580_v10 }
 0xf7d   : > { %v2583_v15 = vrot.slane %v2582_v12, 4 }
 0xf7f   : > { %v2584_v19 = vadd.f32 %v2583_v15, %v2582_v12 }
 0xf81   : > { %v2585_v20 = vrot.slane %v2584_v19, 2 }
 0xf83   : > { %v2586_v21 = vadd.f32 %v2585_v20, %v2584_v19 }
 0xf85   : > { %v2587_v23 = vrot.slane %v2586_v21, 1 }
 0xf87   : > { %v2588_v24 = vadd.f32 %v2587_v23, %v2586_v21 }
 0xf89   : > { %v2590_v16 = vmul.f32 0.03125, %v2588_v24 }
 0xf8b   : > { %v2593_v25 = vsub.f32 %v2573_v7, %v2590_v16  ;;  %v2594_v26 = vsub.f32 %v2574_v6, %v2590_v16  ;;  %v2591_v28 = vsub.f32 %v2571_v34, %v2590_v16  ;;  %v2592_v30 = vsub.f32 %v2572_v22, %v2590_v16 }
 0xf8d   : > { %v2597_v17 = vmul.f32 %v2593_v25, %v2593_v25  ;;  %v2595_v31 = vmul.f32 %v2591_v28, %v2591_v28  ;;  %v2596_v32 = vmul.f32 %v2592_v30, %v2592_v30  ;;  %v2598_v33 = vmul.f32 %v2594_v26, %v2594_v26 }
 0xf8f   : > { %v2599_v35 = vsel %vm2575_vm15, %v2595_v31, 0.0  ;;  %v2600_v36 = vsel %vm2575_vm15, %v2596_v32, 0.0  ;;  %v2602_v37 = vsel %vm2575_vm15, %v2597_v17, 0.0  ;;  %v2604_v38 = vsel %vm2575_vm15, %v2598_v33, 0.0 }
 0xf90   : > { %v2601_v62 = vadd.f32 %v2600_v36, %v2599_v35 }
 0xf92   : > { %v2603_v48 = vadd.f32 %v2602_v37, %v2601_v62 }
 0xf94   : > { %v2605_v27 = vadd.f32 %v2604_v38, %v2603_v48 }
 0xf96   : > { %v2606_v39 = vrot.slane %v2605_v27, 4 }
 0xf98   : > { %v2607_v5 = vadd.f32 %v2606_v39, %v2605_v27 }
 0xf9a   : > { %v2608_v41 = vrot.slane %v2607_v5, 2 }
 0xf9c   : > { %v2609_v29 = vadd.f32 %v2608_v41, %v2607_v5 }
 0xf9e   : > { %v2610_v42 = vrot.slane %v2609_v29, 1 }
 0xfa0   : > { %v2611_v0 = vadd.f32 %v2610_v42, %v2609_v29 }
 0xfa2   : > { %v2612_v43 = vmul.f32 0.03125, %v2611_v0 }
 0xfa4   : > { %v2613_v46 = vadd.f32 1e-05, %v2612_v43 }
 0xfa6   : > { %3046 = vrsqrt.f32 %v2613_v46 }
 0xfb3   : > { %v3047_v50 = vpop.eup %3046 }
 0xfb4   : > { %v2616_v51 = vmul.f32 %v3047_v50, %v2592_v30  ;;  %v2615_v40 = vmul.f32 %v3047_v50, %v2591_v28  ;;  %v2618_v53 = vmul.f32 %v3047_v50, %v2594_v26  ;;  %v2617_v54 = vmul.f32 %v3047_v50, %v2593_v25 }
 0xfb6   : > { %v2632_v57 = vmul.f32 %v2622_v44, %v2616_v51  ;;  %v2631_v14 = vmul.f32 %v2620_v45, %v2615_v40  ;;  %v2634_v13 = vmul.f32 %v2626_v47, %v2618_v53  ;;  %v2633_v58 = vmul.f32 %v2624_v49, %v2617_v54 }
 0xfb8   : > { %v2648_v59 = vadd.f32 %v2638_v8, %v2632_v57  ;;  %v2647_v60 = vadd.f32 %v2636_v18, %v2631_v14  ;;  %v2650_v61 = vadd.f32 %v2642_v55, %v2634_v13  ;;  %v2649_v63 = vadd.f32 %v2640_v56, %v2633_v58 }
 0xfba   : > { %2652 = vst.msk [vmem:[%s140_s19 + $0x8] sm:$0xff] %vm2575_vm15, %v2648_v59  ;;  %2651 = vst.msk [vmem:[%s140_s19] sm:$0xff] %vm2575_vm15, %v2647_v60 }
 0xfbb   : > { %2654 = vst.msk [vmem:[%s140_s19 + $0x18] sm:$0xff] %vm2575_vm15, %v2650_v61  ;;  %2653 = vst.msk [vmem:[%s140_s19 + $0x10] sm:$0xff] %vm2575_vm15, %v2649_v63 }
 0xfbc PF: > { %s12_s9 = sadd.s32 1, %s3055_s9  }
 0xfbd   : > { %p9_p4 = scmp.ge.s32.totalorder %s12_s9, 4  }
 0xfbf   :  { %11 = sbr.rel (!%p9_p4) target bundleno = 1 (0x1), region = 59 }

</bundles_post_ra>
